<compile_context>
chip_gen: v5e
topology: v5e:2x2
jax: 0.10.0
libtpu: 0.0.40
codegen_flags: <defaults>
</compile_context>

<pallas_src>
import jax
import jax.numpy as jnp
from jax.experimental import pallas as pl
from jax.experimental.pallas import tpu as pltpu

D_IN = 64 * 3 * 3     # 576 (fc1 in_features)
D_HID = 32 * 3 * 3    # 288 (fc1/fc2 out_features, fc3 in_features)
MAX_TILE_B = 1024     # batch tile cap (review: 512-1024 rows ~ 85% HBM roofline)
SUBLANE = 16          # bf16 sublane packing granularity


def _round_up(x, m):
    return (x + m - 1) // m * m


def _mlp_kernel(x_ref, w1_ref, b1_ref, w2_ref, b2_ref, w3_ref, b3_ref, o_ref):
    # fc1 + relu  (bf16 MXU inputs, f32 accumulation, f32 epilogue)
    x = x_ref[...].astype(jnp.bfloat16)          # no-op: x arrives as bf16
    h1 = jnp.dot(x, w1_ref[...], preferred_element_type=jnp.float32)
    h1 = jnp.maximum(h1 + b1_ref[...], 0.0)
    # fc2 + relu
    h2 = jnp.dot(h1.astype(jnp.bfloat16), w2_ref[...],
                 preferred_element_type=jnp.float32)
    h2 = jnp.maximum(h2 + b2_ref[...], 0.0)
    # fc3 + tanh (stores exactly action_size columns; boundary rows masked)
    h3 = jnp.dot(h2.astype(jnp.bfloat16), w3_ref[...],
                 preferred_element_type=jnp.float32)
    o_ref[...] = jnp.tanh(h3 + b3_ref[...]).astype(o_ref.dtype)


def _resident(shape):
    # Weights/biases: constant index_map -> fetched once, VMEM-resident.
    # Buffered(1): single buffer, no pointless double-buffering of constants.
    return pl.BlockSpec(shape, lambda i: (0, 0), pipeline_mode=pl.Buffered(1))


def net_forward(x, w1, b1, w2, b2, w3, b3):
    """x: (B, 576) bf16 (or f32). Weights bf16 (in, out), biases f32 (1, out).

    Returns (B, action_size) float32.  No host-side padding or slicing: the
    grid is ragged and Pallas masks the boundary output rows.
    """
    B, d_in = x.shape
    assert d_in == D_IN
    action_size = w3.shape[1]

    # Batch tile: multiple of 16 (bf16 sublanes), capped at MAX_TILE_B.
    # cdiv(B, 2) keeps grid >= 2 for moderate/large B so the "parallel" axis
    # feeds both v7x TensorCores; on v5e/v6e the extra grid step is ~0.35 us.
    tile_b = min(MAX_TILE_B, _round_up(max(1, pl.cdiv(B, 2)), SUBLANE))
    grid = (pl.cdiv(B, tile_b),)

    flops = 2 * B * (D_IN * D_HID + D_HID * D_HID + D_HID * action_size)
    bytes_accessed = (
        int(x.size) * x.dtype.itemsize
        + sum(int(a.size) * a.dtype.itemsize for a in (w1, b1, w2, b2, w3, b3))
        + B * action_size * 4)

    out = pl.pallas_call(
        _mlp_kernel,
        out_shape=jax.ShapeDtypeStruct((B, action_size), jnp.float32),
        grid=grid,
        in_specs=[
            pl.BlockSpec((tile_b, D_IN), lambda i: (i, 0)),   # x tile (pipelined)
            _resident((D_IN, D_HID)),                         # w1
            _resident((1, D_HID)),                            # b1
            _resident((D_HID, D_HID)),                        # w2
            _resident((1, D_HID)),                            # b2
            _resident((D_HID, action_size)),                  # w3
            _resident((1, action_size)),                      # b3
        ],
        out_specs=pl.BlockSpec((tile_b, action_size), lambda i: (i, 0)),
        compiler_params=pltpu.CompilerParams(
            dimension_semantics=("parallel",)),
        cost_estimate=pl.CostEstimate(
            flops=flops,
            transcendentals=B * action_size,
            bytes_accessed=bytes_accessed),
    )(x, w1, b1, w2, b2, w3, b3)

    return out


def init_params(key, action_size):
    """Deterministic synthetic params matching nn.Linear shapes.

    torch stores Linear weight as (out, in); we store the transpose (in, out)
    so the kernel does x @ W without an in-kernel transpose.  Weights are bf16
    (MXU inputs / halved HBM traffic); biases stay f32 (added to the f32
    accumulator) and are 2D (1, out) for TPU-friendly broadcasting.
    """
    k1, k2, k3, k4, k5, k6 = jax.random.split(key, 6)

    def uni(k, shape, fan_in, dtype):
        bound = 1.0 / jnp.sqrt(fan_in)
        return jax.random.uniform(k, shape, jnp.float32, -bound, bound).astype(dtype)

    w1 = uni(k1, (D_IN, D_HID), D_IN, jnp.bfloat16)
    b1 = uni(k2, (1, D_HID), D_IN, jnp.float32)
    w2 = uni(k3, (D_HID, D_HID), D_HID, jnp.bfloat16)
    b2 = uni(k4, (1, D_HID), D_HID, jnp.float32)
    w3 = uni(k5, (D_HID, action_size), D_HID, jnp.bfloat16)
    b3 = uni(k6, (1, action_size), D_HID, jnp.float32)
    return w1, b1, w2, b2, w3, b3


def reference_forward(x, w1, b1, w2, b2, w3, b3):
    """Pure-JAX reference mirroring the kernel's bf16-operand / f32-acc math."""
    def bf16(a):
        return a.astype(jnp.bfloat16).astype(jnp.float32)
    h1 = jnp.maximum(bf16(x) @ bf16(w1) + b1, 0.0)
    h2 = jnp.maximum(bf16(h1) @ bf16(w2) + b2, 0.0)
    return jnp.tanh(bf16(h2) @ bf16(w3) + b3)


if __name__ == "__main__":
    key = jax.random.PRNGKey(0)
    kx, kp = jax.random.split(key)

    batch = 10          # deliberately not tile-aligned: exercises the ragged
                        # last block (masked boundary output rows)
    action_size = 32

    # x arrives as bf16 (cast at the producer, not a standalone wrapper pass)
    # so the kernel reads half the HBM bytes for the dominant tensor.
    x = jax.random.normal(kx, (batch, D_IN), jnp.float32).astype(jnp.bfloat16)
    params = init_params(kp, action_size)

    out = jax.block_until_ready(net_forward(x, *params))

    ref = reference_forward(x.astype(jnp.float32), *params)
    assert out.shape == (batch, action_size)
    assert out.dtype == jnp.float32
    assert jnp.allclose(out, ref, atol=2e-3, rtol=2e-3), (
        float(jnp.max(jnp.abs(out - ref))))

    # TODO(synk): conv1/conv2/conv3 are declared in __init__ but never used in
    # forward(), so they are intentionally not implemented.
    print("KERNEL_OK")
</pallas_src>

<mosaic_0001>
module attributes {stable_mosaic.version = 11 : i64} {
  func.func @_mlp_kernel(%arg0: i32, %arg1: memref<16x576xbf16, #tpu.memory_space<vmem>>, %arg2: memref<576x288xbf16, #tpu.memory_space<vmem>>, %arg3: memref<1x288xf32, #tpu.memory_space<vmem>>, %arg4: memref<288x288xbf16, #tpu.memory_space<vmem>>, %arg5: memref<1x288xf32, #tpu.memory_space<vmem>>, %arg6: memref<288x32xbf16, #tpu.memory_space<vmem>>, %arg7: memref<1x32xf32, #tpu.memory_space<vmem>>, %arg8: memref<16x32xf32, #tpu.memory_space<vmem>>) attributes {dimension_semantics = [#tpu.dimension_semantics<parallel>], iteration_bounds = array<i64: 1>, scalar_prefetch = 0 : i64, scratch_operands = 0 : i64, tpu.core_type = #tpu.core_type<tc>, window_params = [{transform_indices = @transform_0, window_bounds = array<i64: 16, 576>}, {pipeline_mode = #tpu.pipeline_mode<synchronous>, transform_indices = @transform_1, window_bounds = array<i64: 576, 288>}, {pipeline_mode = #tpu.pipeline_mode<synchronous>, transform_indices = @transform_2, window_bounds = array<i64: 1, 288>}, {pipeline_mode = #tpu.pipeline_mode<synchronous>, transform_indices = @transform_3, window_bounds = array<i64: 288, 288>}, {pipeline_mode = #tpu.pipeline_mode<synchronous>, transform_indices = @transform_4, window_bounds = array<i64: 1, 288>}, {pipeline_mode = #tpu.pipeline_mode<synchronous>, transform_indices = @transform_5, window_bounds = array<i64: 288, 32>}, {pipeline_mode = #tpu.pipeline_mode<synchronous>, transform_indices = @transform_6, window_bounds = array<i64: 1, 32>}, {transform_indices = @transform_7, window_bounds = array<i64: 16, 32>}]} {
    %c0 = arith.constant 0 : index
    %c0_0 = arith.constant 0 : index
    %0 = vector.load %arg1[%c0, %c0_0] : memref<16x576xbf16, #tpu.memory_space<vmem>>, vector<16x576xbf16>
    %c0_1 = arith.constant 0 : index
    %c0_2 = arith.constant 0 : index
    %1 = vector.load %arg2[%c0_1, %c0_2] : memref<576x288xbf16, #tpu.memory_space<vmem>>, vector<576x288xbf16>
    %cst = arith.constant dense<0.000000e+00> : vector<16x288xf32>
    %2 = tpu.matmul %0, %1, %cst {dimension_numbers = #tpu.dot_dimension_numbers<[1], [0], [0], [1], [0, 0, 1, 1], [], []>} : vector<16x576xbf16>, vector<576x288xbf16>, vector<16x288xf32> -> vector<16x288xf32>
    %c0_3 = arith.constant 0 : index
    %c0_4 = arith.constant 0 : index
    %3 = vector.load %arg3[%c0_3, %c0_4] : memref<1x288xf32, #tpu.memory_space<vmem>>, vector<1x288xf32>
    %4 = vector.broadcast %3 : vector<1x288xf32> to vector<16x288xf32>
    %5 = arith.addf %2, %4 : vector<16x288xf32>
    %cst_5 = arith.constant 0.000000e+00 : f32
    %6 = vector.broadcast %cst_5 : f32 to vector<16x288xf32>
    %7 = arith.maximumf %5, %6 : vector<16x288xf32>
    %8 = arith.truncf %7 : vector<16x288xf32> to vector<16x288xbf16>
    %c0_6 = arith.constant 0 : index
    %c0_7 = arith.constant 0 : index
    %9 = vector.load %arg4[%c0_6, %c0_7] : memref<288x288xbf16, #tpu.memory_space<vmem>>, vector<288x288xbf16>
    %cst_8 = arith.constant dense<0.000000e+00> : vector<16x288xf32>
    %10 = tpu.matmul %8, %9, %cst_8 {dimension_numbers = #tpu.dot_dimension_numbers<[1], [0], [0], [1], [0, 0, 1, 1], [], []>} : vector<16x288xbf16>, vector<288x288xbf16>, vector<16x288xf32> -> vector<16x288xf32>
    %c0_9 = arith.constant 0 : index
    %c0_10 = arith.constant 0 : index
    %11 = vector.load %arg5[%c0_9, %c0_10] : memref<1x288xf32, #tpu.memory_space<vmem>>, vector<1x288xf32>
    %12 = vector.broadcast %11 : vector<1x288xf32> to vector<16x288xf32>
    %13 = arith.addf %10, %12 : vector<16x288xf32>
    %cst_11 = arith.constant 0.000000e+00 : f32
    %14 = vector.broadcast %cst_11 : f32 to vector<16x288xf32>
    %15 = arith.maximumf %13, %14 : vector<16x288xf32>
    %16 = arith.truncf %15 : vector<16x288xf32> to vector<16x288xbf16>
    %c0_12 = arith.constant 0 : index
    %c0_13 = arith.constant 0 : index
    %17 = vector.load %arg6[%c0_12, %c0_13] : memref<288x32xbf16, #tpu.memory_space<vmem>>, vector<288x32xbf16>
    %cst_14 = arith.constant dense<0.000000e+00> : vector<16x32xf32>
    %18 = tpu.matmul %16, %17, %cst_14 {dimension_numbers = #tpu.dot_dimension_numbers<[1], [0], [0], [1], [0, 0, 1, 1], [], []>} : vector<16x288xbf16>, vector<288x32xbf16>, vector<16x32xf32> -> vector<16x32xf32>
    %c0_15 = arith.constant 0 : index
    %c0_16 = arith.constant 0 : index
    %19 = vector.load %arg7[%c0_15, %c0_16] : memref<1x32xf32, #tpu.memory_space<vmem>>, vector<1x32xf32>
    %20 = vector.broadcast %19 : vector<1x32xf32> to vector<16x32xf32>
    %21 = arith.addf %18, %20 : vector<16x32xf32>
    %22 = math.tanh %21 : vector<16x32xf32>
    %c0_17 = arith.constant 0 : index
    %c0_18 = arith.constant 0 : index
    %23 = vector.load %arg8[%c0_17, %c0_18] : memref<16x32xf32, #tpu.memory_space<vmem>>, vector<16x32xf32>
    tpu.vector_store %arg8[%c0_17, %c0_18], %22 {strides = array<i32>} : memref<16x32xf32, #tpu.memory_space<vmem>>, vector<16x32xf32>,
    return
  }
  func.func @transform_0(%arg0: i32) -> (i32, i32) {
    %c0_i32 = arith.constant 0 : i32
    %c0_i32_0 = arith.constant 0 : i32
    return %arg0, %c0_i32 : i32, i32
  }
  func.func @transform_1(%arg0: i32) -> (i32, i32) {
    %c0_i32 = arith.constant 0 : i32
    %c0_i32_0 = arith.constant 0 : i32
    %c0_i32_1 = arith.constant 0 : i32
    return %c0_i32, %c0_i32_0 : i32, i32
  }
  func.func @transform_2(%arg0: i32) -> (i32, i32) {
    %c0_i32 = arith.constant 0 : i32
    %c0_i32_0 = arith.constant 0 : i32
    %c0_i32_1 = arith.constant 0 : i32
    return %c0_i32, %c0_i32_0 : i32, i32
  }
  func.func @transform_3(%arg0: i32) -> (i32, i32) {
    %c0_i32 = arith.constant 0 : i32
    %c0_i32_0 = arith.constant 0 : i32
    %c0_i32_1 = arith.constant 0 : i32
    return %c0_i32, %c0_i32_0 : i32, i32
  }
  func.func @transform_4(%arg0: i32) -> (i32, i32) {
    %c0_i32 = arith.constant 0 : i32
    %c0_i32_0 = arith.constant 0 : i32
    %c0_i32_1 = arith.constant 0 : i32
    return %c0_i32, %c0_i32_0 : i32, i32
  }
  func.func @transform_5(%arg0: i32) -> (i32, i32) {
    %c0_i32 = arith.constant 0 : i32
    %c0_i32_0 = arith.constant 0 : i32
    %c0_i32_1 = arith.constant 0 : i32
    return %c0_i32, %c0_i32_0 : i32, i32
  }
  func.func @transform_6(%arg0: i32) -> (i32, i32) {
    %c0_i32 = arith.constant 0 : i32
    %c0_i32_0 = arith.constant 0 : i32
    %c0_i32_1 = arith.constant 0 : i32
    return %c0_i32, %c0_i32_0 : i32, i32
  }
  func.func @transform_7(%arg0: i32) -> (i32, i32) {
    %c0_i32 = arith.constant 0 : i32
    %c0_i32_0 = arith.constant 0 : i32
    return %arg0, %c0_i32 : i32, i32
  }
}

</mosaic_0001>

<bundles_post_ra>
// kernel: tpu_custom_call.1
= control target key start
LH: loop header
LB: loop body
LE: loop exit
PB: predicated region body
PF: predicated region fallthrough
CT: control target
= control target key end

     0   :  { %vm787_vm0 = vcmask 523264   ;;  %s3858_s0 = inlined_call_operand.vmem [shape: bf16[10,576], index: 0, kind: input, shape index: {}]   ;;  %s3859_s1 = inlined_call_operand.vmem [shape: bf16[576,288], index: 1, kind: input, shape index: {}]   ;;  %s3860_s2 = inlined_call_operand.vmem [shape: f32[1,288], index: 2, kind: input, shape index: {}]   ;;  %s3861_s3 = inlined_call_operand.vmem [shape: bf16[288,288], index: 3, kind: input, shape index: {}]   ;;  %s3862_s4 = inlined_call_operand.vmem [shape: f32[1,288], index: 4, kind: input, shape index: {}]   ;;  %s3863_s5 = inlined_call_operand.vmem [shape: bf16[288,32], index: 5, kind: input, shape index: {}]   ;;  %s3864_s6 = inlined_call_operand.vmem [shape: f32[1,32], index: 6, kind: input, shape index: {}]   ;;  %s3865_s7 = inlined_call_operand.hbm [shape: f32[10,32], index: 7, kind: output, shape index: {}]  }
   0x1   :  { %v1838_v0 = vld [vmem:[%s3859_s1 + $0xa8] sm:$0xf]  ;;  %v2506_v1 = vld [vmem:[%s3859_s1 + $0xb0] sm:$0xf0]  ;;  %v1826_v11 = vld [vmem:[%s3859_s1 + $0x90] sm:$0xf] }
   0x2   :  { %v1934_v2 = vld [vmem:[%s3859_s1 + $0x168] sm:$0xf]  ;;  %v1839_v3 = vor.u32 %v2506_v1, %v1838_v0  ;;  %v2530_v4 = vld [vmem:[%s3859_s1 + $0x170] sm:$0xf0]  ;;  %v2503_v13 = vld [vmem:[%s3859_s1 + $0x98] sm:$0xf0] }
   0x3   :  { %v2030_v5 = vld [vmem:[%s3859_s1 + $0x228] sm:$0xf]  ;;  %v2554_v6 = vld [vmem:[%s3859_s1 + $0x230] sm:$0xf0]  ;;  %v1935_v7 = vor.u32 %v2530_v4, %v1934_v2  ;;  %v1922_v14 = vld [vmem:[%s3859_s1 + $0x150] sm:$0xf]  ;;  %v1827_v16 = vor.u32 %v2503_v13, %v1826_v11 }
   0x4   :  { %v2031_v8 = vor.u32 %v2554_v6, %v2030_v5  ;;  %v2126_v9 = vld [vmem:[%s3859_s1 + $0x2e8] sm:$0xf]  ;;  %v2578_v10 = vld [vmem:[%s3859_s1 + $0x2f0] sm:$0xf0]  ;;  %791 = vmatpush.bf16.msra.mxu0 %v1839_v3  ;;  %v2527_v15 = vld [vmem:[%s3859_s1 + $0x158] sm:$0xf0] }
   0x5   :  { %v2127_v12 = vor.u32 %v2578_v10, %v2126_v9  ;;  %805 = vmatpush.bf16.msra.mxu1 %v1935_v7  ;;  %v1923_v17 = vor.u32 %v2527_v15, %v1922_v14  ;;  %v2018_v18 = vld [vmem:[%s3859_s1 + $0x210] sm:$0xf]  ;;  %v2551_v19 = vld [vmem:[%s3859_s1 + $0x218] sm:$0xf0]  ;;  %v1814_v23 = vld [vmem:[%s3859_s1 + $0x78] sm:$0xf] }
   0x6   :  { %819 = vmatpush.bf16.msra.mxu2 %v2031_v8  ;;  %v2114_v20 = vld [vmem:[%s3859_s1 + $0x2d0] sm:$0xf]  ;;  %v2019_v21 = vor.u32 %v2551_v19, %v2018_v18  ;;  %v2575_v22 = vld [vmem:[%s3859_s1 + $0x2d8] sm:$0xf0]  ;;  %v2500_v24 = vld [vmem:[%s3859_s1 + $0x80] sm:$0xf0] }
   0x7   :  { %833 = vmatpush.bf16.msra.mxu3 %v2127_v12  ;;  %v2115_v25 = vor.u32 %v2575_v22, %v2114_v20  ;;  %v1910_v26 = vld [vmem:[%s3859_s1 + $0x138] sm:$0xf]  ;;  %v2524_v27 = vld [vmem:[%s3859_s1 + $0x140] sm:$0xf0]  ;;  %v1815_v29 = vor.u32 %v2500_v24, %v1814_v23  ;;  %v1802_v35 = vld [vmem:[%s3859_s1 + $0x60] sm:$0xf] }
   0x8   :  { %v2006_v28 = vld [vmem:[%s3859_s1 + $0x1f8] sm:$0xf]  ;;  %792 = vmatpush.bf16.msra.mxu0 %v1827_v16  ;;  %v2548_v30 = vld [vmem:[%s3859_s1 + $0x200] sm:$0xf0]  ;;  %v1911_v33 = vor.u32 %v2524_v27, %v1910_v26  ;;  %v2497_v36 = vld [vmem:[%s3859_s1 + $0x68] sm:$0xf0] }
   0x9   :  { %v2102_v31 = vld [vmem:[%s3859_s1 + $0x2b8] sm:$0xf]  ;;  %v2572_v32 = vld [vmem:[%s3859_s1 + $0x2c0] sm:$0xf0]  ;;  %806 = vmatpush.bf16.msra.mxu1 %v1923_v17  ;;  %v2007_v34 = vor.u32 %v2548_v30, %v2006_v28  ;;  %v1898_v37 = vld [vmem:[%s3859_s1 + $0x120] sm:$0xf]  ;;  %v1803_v44 = vor.u32 %v2497_v36, %v1802_v35 }
   0xa   :  { %820 = vmatpush.bf16.msra.mxu2 %v2019_v21  ;;  %v2103_v38 = vor.u32 %v2572_v32, %v2102_v31  ;;  %v2521_v39 = vld [vmem:[%s3859_s1 + $0x128] sm:$0xf0]  ;;  %v1994_v40 = vld [vmem:[%s3859_s1 + $0x1e0] sm:$0xf]  ;;  %v1790_v47 = vld [vmem:[%s3859_s1 + $0x48] sm:$0xf] }
   0xb   :  { %834 = vmatpush.bf16.msra.mxu3 %v2115_v25  ;;  %v2545_v41 = vld [vmem:[%s3859_s1 + $0x1e8] sm:$0xf0]  ;;  %v2090_v42 = vld [vmem:[%s3859_s1 + $0x2a0] sm:$0xf]  ;;  %v1899_v45 = vor.u32 %v2521_v39, %v1898_v37  ;;  %v2494_v48 = vld [vmem:[%s3859_s1 + $0x50] sm:$0xf0] }
   0xc   :  { %v2569_v43 = vld [vmem:[%s3859_s1 + $0x2a8] sm:$0xf0]  ;;  %793 = vmatpush.bf16.msra.mxu0 %v1815_v29  ;;  %v1995_v46 = vor.u32 %v2545_v41, %v1994_v40  ;;  %v1886_v49 = vld [vmem:[%s3859_s1 + $0x108] sm:$0xf]  ;;  %v2518_v51 = vld [vmem:[%s3859_s1 + $0x110] sm:$0xf0]  ;;  %v1791_v56 = vor.u32 %v2494_v48, %v1790_v47 }
   0xd   :  { %807 = vmatpush.bf16.msra.mxu1 %v1911_v33  ;;  %v2091_v50 = vor.u32 %v2569_v43, %v2090_v42  ;;  %v1982_v52 = vld [vmem:[%s3859_s1 + $0x1c8] sm:$0xf]  ;;  %v2542_v53 = vld [vmem:[%s3859_s1 + $0x1d0] sm:$0xf0]  ;;  %v1887_v57 = vor.u32 %v2518_v51, %v1886_v49  ;;  %v1778_v59 = vld [vmem:[%s3859_s1 + $0x30] sm:$0xf] }
   0xe   :  { %821 = vmatpush.bf16.msra.mxu2 %v2007_v34  ;;  %v2078_v54 = vld [vmem:[%s3859_s1 + $0x288] sm:$0xf]  ;;  %v2566_v55 = vld [vmem:[%s3859_s1 + $0x290] sm:$0xf0]  ;;  %v1983_v58 = vor.u32 %v2542_v53, %v1982_v52  ;;  %v2491_v60 = vld [vmem:[%s3859_s1 + $0x38] sm:$0xf0] }
   0xf   :  { %835 = vmatpush.bf16.msra.mxu3 %v2103_v38  ;;  %v1874_v61 = vld [vmem:[%s3859_s1 + $0xf0] sm:$0xf]  ;;  %v2079_v62 = vor.u32 %v2566_v55, %v2078_v54  ;;  %v2515_v63 = vld [vmem:[%s3859_s1 + $0xf8] sm:$0xf0]  ;;  %v1779_v4 = vor.u32 %v2491_v60, %v1778_v59  ;;  %v1766_v5 = vld [vmem:[%s3859_s1 + $0x18] sm:$0xf] }
  0x10   :  { %794 = vmatpush.bf16.msra.mxu0 %v1803_v44  ;;  %v1970_v0 = vld [vmem:[%s3859_s1 + $0x1b0] sm:$0xf]  ;;  %v2539_v1 = vld [vmem:[%s3859_s1 + $0x1b8] sm:$0xf0]  ;;  %v1875_v6 = vor.u32 %v2515_v63, %v1874_v61  ;;  %v2488_v8 = vld [vmem:[%s3859_s1 + $0x20] sm:$0xf0] }
  0x11   :  { %808 = vmatpush.bf16.msra.mxu1 %v1899_v45  ;;  %v2066_v2 = vld [vmem:[%s3859_s1 + $0x270] sm:$0xf]  ;;  %v2563_v3 = vld [vmem:[%s3859_s1 + $0x278] sm:$0xf0]  ;;  %v1971_v7 = vor.u32 %v2539_v1, %v1970_v0  ;;  %v1862_v9 = vld [vmem:[%s3859_s1 + $0xd8] sm:$0xf]  ;;  %v1767_v18 = vor.u32 %v2488_v8, %v1766_v5 }
  0x12   :  { %822 = vmatpush.bf16.msra.mxu2 %v1995_v46  ;;  %v2512_v10 = vld [vmem:[%s3859_s1 + $0xe0] sm:$0xf0]  ;;  %v2067_v11 = vor.u32 %v2563_v3, %v2066_v2  ;;  %v1958_v12 = vld [vmem:[%s3859_s1 + $0x198] sm:$0xf]  ;;  %v1754_v16 = vld [vmem:[%s3859_s1] sm:$0xf] }
  0x13   :  { %836 = vmatpush.bf16.msra.mxu3 %v2091_v50  ;;  %v2536_v13 = vld [vmem:[%s3859_s1 + $0x1a0] sm:$0xf0]  ;;  %v2054_v14 = vld [vmem:[%s3859_s1 + $0x258] sm:$0xf]  ;;  %v2485_v17 = vld [vmem:[%s3859_s1 + $0x8] sm:$0xf0]  ;;  %v1863_v23 = vor.u32 %v2512_v10, %v1862_v9 }
  0x14   :  { %795 = vmatpush.bf16.msra.mxu0 %v1791_v56  ;;  %v2560_v15 = vld [vmem:[%s3859_s1 + $0x260] sm:$0xf0]  ;;  %v1850_v19 = vld [vmem:[%s3859_s1 + $0xc0] sm:$0xf]  ;;  %v2509_v20 = vld [vmem:[%s3859_s1 + $0xc8] sm:$0xf0]  ;;  %v1959_v24 = vor.u32 %v2536_v13, %v1958_v12  ;;  %v1755_v35 = vor.u32 %v2485_v17, %v1754_v16 }
  0x15   :  { %809 = vmatpush.bf16.msra.mxu1 %v1887_v57  ;;  %v1946_v21 = vld [vmem:[%s3859_s1 + $0x180] sm:$0xf]  ;;  %v2533_v22 = vld [vmem:[%s3859_s1 + $0x188] sm:$0xf0]  ;;  %v2174_v25 = vld [vmem:[%s3859_s1 + $0x348] sm:$0xf]  ;;  %v2055_v28 = vor.u32 %v2560_v15, %v2054_v14  ;;  %v1851_v39 = vor.u32 %v2509_v20, %v1850_v19 }
  0x16   :  { %823 = vmatpush.bf16.msra.mxu2 %v1983_v58  ;;  %v2590_v26 = vld [vmem:[%s3859_s1 + $0x350] sm:$0xf0]  ;;  %v2505_v27 = vld [vmem:[%s3859_s1 + $0xac] sm:$0xf]  ;;  %v1840_v29 = vld [vmem:[%s3859_s1 + $0xb4] sm:$0xf0]  ;;  %v1947_v40 = vor.u32 %v2533_v22, %v1946_v21 }
  0x17   :  { %837 = vmatpush.bf16.msra.mxu3 %v2079_v62  ;;  %v2529_v30 = vld [vmem:[%s3859_s1 + $0x16c] sm:$0xf]  ;;  %v1936_v31 = vld [vmem:[%s3859_s1 + $0x174] sm:$0xf0]  ;;  %v2042_v32 = vld [vmem:[%s3859_s1 + $0x240] sm:$0xf]  ;;  %v2175_v44 = vor.u32 %v2590_v26, %v2174_v25  ;;  %v1843_v45 = vor.u32 %v2505_v27, %v1840_v29 }
  0x18   :  { %796 = vmatpush.bf16.msra.mxu0 %v1779_v4  ;;  %v2557_v33 = vld [vmem:[%s3859_s1 + $0x248] sm:$0xf0]  ;;  %v1734_v34 = vld [vmem:[%s3858_s0] sm:$0xf]  ;;  %v2481_v36 = vld [vmem:[%s3858_s0 + $0x10] sm:$0xf0]  ;;  %v1939_v49 = vor.u32 %v2529_v30, %v1936_v31 }
  0x19   :  { %810 = vmatpush.bf16.msra.mxu1 %v1875_v6  ;;  %v2553_v37 = vld [vmem:[%s3859_s1 + $0x22c] sm:$0xf]  ;;  %v2032_v38 = vld [vmem:[%s3859_s1 + $0x234] sm:$0xf0]  ;;  %v2162_v41 = vld [vmem:[%s3859_s1 + $0x330] sm:$0xf]  ;;  %v2043_v50 = vor.u32 %v2557_v33, %v2042_v32  ;;  %v2990_v54 = vor.u32 %v2481_v36, %v1734_v34 }
  0x1a   :  { %824 = vmatpush.bf16.msra.mxu2 %v1971_v7  ;;  %v2587_v42 = vld [vmem:[%s3859_s1 + $0x338] sm:$0xf0]  ;;  %v2502_v43 = vld [vmem:[%s3859_s1 + $0x94] sm:$0xf]  ;;  %v1828_v46 = vld [vmem:[%s3859_s1 + $0x9c] sm:$0xf0]  ;;  %v2035_v55 = vor.u32 %v2553_v37, %v2032_v38 }
  0x1b   :  { %838 = vmatpush.bf16.msra.mxu3 %v2067_v11  ;;  %v1742_v47 = vld [vmem:[%s3858_s0 + $0x8] sm:$0xf]  ;;  %v2482_v48 = vld [vmem:[%s3858_s0 + $0x18] sm:$0xf0]  ;;  %v2526_v51 = vld [vmem:[%s3859_s1 + $0x154] sm:$0xf]  ;;  %v2163_v63 = vor.u32 %v2587_v42, %v2162_v41  ;;  %v1831_v0 = vor.u32 %v2502_v43, %v1828_v46 }
  0x1c   :  { %797 = vmatpush.bf16.msra.mxu0 %v1767_v18  ;;  %v1924_v52 = vld [vmem:[%s3859_s1 + $0x15c] sm:$0xf0]  ;;  %v2480_v53 = vld [vmem:[%s3858_s0 + $0xc] sm:$0xf]  ;;  %v2479_v57 = vld [vmem:[%s3858_s0 + $0x4] sm:$0xf]  ;;  %v3007_v61 = vor.u32 %v2482_v48, %v1742_v47 }
  0x1d   :  { %811 = vmatpush.bf16.msra.mxu1 %v1863_v23  ;;  %v1744_v56 = vld [vmem:[%s3858_s0 + $0x1c] sm:$0xf0]  ;;  %v1736_v58 = vld [vmem:[%s3858_s0 + $0x14] sm:$0xf0]  ;;  %v2550_v59 = vld [vmem:[%s3859_s1 + $0x214] sm:$0xf]  ;;  %v1927_v2 = vor.u32 %v2526_v51, %v1924_v52 }
  0x1e   :  { %825 = vmatpush.bf16.msra.mxu2 %v1959_v24  ;;  %v2020_v60 = vld [vmem:[%s3859_s1 + $0x21c] sm:$0xf0]  ;;  %v3009_v62 = vor.u32 %v2479_v57, %v1736_v58  ;;  %v2150_v1 = vld [vmem:[%s3859_s1 + $0x318] sm:$0xf]  ;;  %v2584_v3 = vld [vmem:[%s3859_s1 + $0x320] sm:$0xf0]  ;;  %v3023_v6 = vor.u32 %v2480_v53, %v1744_v56 }
  0x1f   :  { %839 = vmatpush.bf16.msra.mxu3 %v2055_v28  ;;  %v2499_v4 = vld [vmem:[%s3859_s1 + $0x7c] sm:$0xf]  ;;  %v1816_v5 = vld [vmem:[%s3859_s1 + $0x84] sm:$0xf0]  ;;  %v2023_v7 = vor.u32 %v2550_v59, %v2020_v60  ;;  %v2151_v12 = vor.u32 %v2584_v3, %v2150_v1  ;;  %v2138_v14 = vld [vmem:[%s3859_s1 + $0x300] sm:$0xf] }
  0x20   :  { %798 = vmatpush.bf16.msra.mxu0 %v1755_v35  ;;  %v2523_v8 = vld [vmem:[%s3859_s1 + $0x13c] sm:$0xf]  ;;  %v1912_v9 = vld [vmem:[%s3859_s1 + $0x144] sm:$0xf0]  ;;  %v1819_v13 = vor.u32 %v2499_v4, %v1816_v5  ;;  %v2581_v15 = vld [vmem:[%s3859_s1 + $0x308] sm:$0xf0] }
  0x21   :  { %812 = vmatpush.bf16.msra.mxu1 %v1851_v39  ;;  %v2547_v10 = vld [vmem:[%s3859_s1 + $0x1fc] sm:$0xf]  ;;  %v2008_v11 = vld [vmem:[%s3859_s1 + $0x204] sm:$0xf0]  ;;  %v1915_v16 = vor.u32 %v2523_v8, %v1912_v9  ;;  %v2496_v17 = vld [vmem:[%s3859_s1 + $0x64] sm:$0xf]  ;;  %v2139_v26 = vor.u32 %v2581_v15, %v2138_v14 }
  0x22   :  { %826 = vmatpush.bf16.msra.mxu2 %v1947_v40  ;;  %v1804_v18 = vld [vmem:[%s3859_s1 + $0x6c] sm:$0xf0]  ;;  %v2520_v19 = vld [vmem:[%s3859_s1 + $0x124] sm:$0xf]  ;;  %v2011_v20 = vor.u32 %v2547_v10, %v2008_v11  ;;  %v2577_v22 = vld [vmem:[%s3859_s1 + $0x2ec] sm:$0xf] }
  0x23   :  { %840 = vmatpush.bf16.msra.mxu3 %v2043_v50  ;;  %799 = vmatmul.bf16.vlgmr.msra.gmra.mxu0 %v2990_v54  ;;  %v1900_v21 = vld [vmem:[%s3859_s1 + $0x12c] sm:$0xf0]  ;;  %v2128_v23 = vld [vmem:[%s3859_s1 + $0x2f4] sm:$0xf0]  ;;  %v2544_v24 = vld [vmem:[%s3859_s1 + $0x1e4] sm:$0xf]  ;;  %v1807_v27 = vor.u32 %v2496_v17, %v1804_v18 }
  0x24   :  { %851 = vmatpush.bf16.msrb.mxu0 %v2175_v44  ;;  %813 = vmatmul.bf16.vlgmr.msra.gmra.mxu1 %v3009_v62  ;;  %v1996_v25 = vld [vmem:[%s3859_s1 + $0x1ec] sm:$0xf0]  ;;  %v2493_v28 = vld [vmem:[%s3859_s1 + $0x4c] sm:$0xf]  ;;  %v1903_v29 = vor.u32 %v2520_v19, %v1900_v21  ;;  %v2131_v30 = vor.u32 %v2577_v22, %v2128_v23  ;;  %v1792_v31 = vld [vmem:[%s3859_s1 + $0x54] sm:$0xf0] }
  0x25   :  { %861 = vmatpush.bf16.msrb.mxu1 %v1843_v45  ;;  %827 = vmatmul.bf16.vlgmr.msra.gmra.mxu2 %v3007_v61  ;;  %v2517_v32 = vld [vmem:[%s3859_s1 + $0x10c] sm:$0xf]  ;;  %v1888_v33 = vld [vmem:[%s3859_s1 + $0x114] sm:$0xf0]  ;;  %v1999_v34 = vor.u32 %v2544_v24, %v1996_v25  ;;  %v2574_v35 = vld [vmem:[%s3859_s1 + $0x2d4] sm:$0xf]  ;;  %v1795_v41 = vor.u32 %v2493_v28, %v1792_v31 }
  0x26   :  { %875 = vmatpush.bf16.msrb.mxu2 %v1939_v49  ;;  %841 = vmatmul.bf16.vlgmr.msra.gmra.mxu3 %v3023_v6  ;;  %v2116_v36 = vld [vmem:[%s3859_s1 + $0x2dc] sm:$0xf0]  ;;  %v1750_v37 = vld [vmem:[%s3858_s0 + $0x10] sm:$0xf]  ;;  %v2483_v38 = vld [vmem:[%s3858_s0 + $0x20] sm:$0xf0]  ;;  %v1891_v42 = vor.u32 %v2517_v32, %v1888_v33 }
  0x27   :  { %889 = vmatpush.bf16.msrb.mxu3 %v2035_v55  ;;  %v2541_v39 = vld [vmem:[%s3859_s1 + $0x1cc] sm:$0xf]  ;;  %v1984_v40 = vld [vmem:[%s3859_s1 + $0x1d4] sm:$0xf0]  ;;  %v2119_v43 = vor.u32 %v2574_v35, %v2116_v36  ;;  %v2490_v44 = vld [vmem:[%s3859_s1 + $0x34] sm:$0xf]  ;;  %v3110_v47 = vor.u32 %v2483_v38, %v1750_v37 }
  0x28   :  { %852 = vmatpush.bf16.msrb.mxu0 %v2163_v63  ;;  %v1780_v45 = vld [vmem:[%s3859_s1 + $0x3c] sm:$0xf0]  ;;  %v2514_v46 = vld [vmem:[%s3859_s1 + $0xf4] sm:$0xf]  ;;  %v1987_v48 = vor.u32 %v2541_v39, %v1984_v40  ;;  %v2571_v50 = vld [vmem:[%s3859_s1 + $0x2bc] sm:$0xf] }
  0x29   :  { %862 = vmatpush.bf16.msrb.mxu1 %v1831_v0  ;;  %v1876_v49 = vld [vmem:[%s3859_s1 + $0xfc] sm:$0xf0]  ;;  %v2104_v51 = vld [vmem:[%s3859_s1 + $0x2c4] sm:$0xf0]  ;;  %v2538_v52 = vld [vmem:[%s3859_s1 + $0x1b4] sm:$0xf]  ;;  %v1783_v55 = vor.u32 %v2490_v44, %v1780_v45 }
  0x2a   :  { %876 = vmatpush.bf16.msrb.mxu2 %v1927_v2  ;;  %v1972_v53 = vld [vmem:[%s3859_s1 + $0x1bc] sm:$0xf0]  ;;  %v1879_v56 = vor.u32 %v2514_v46, %v1876_v49  ;;  %v2107_v57 = vor.u32 %v2571_v50, %v2104_v51  ;;  %v2487_v58 = vld [vmem:[%s3859_s1 + $0x1c] sm:$0xf]  ;;  %v1768_v59 = vld [vmem:[%s3859_s1 + $0x24] sm:$0xf0] }
  0x2b   :  { %890 = vmatpush.bf16.msrb.mxu3 %v2023_v7  ;;  %v2511_v60 = vld [vmem:[%s3859_s1 + $0xdc] sm:$0xf]  ;;  %v1975_v63 = vor.u32 %v2538_v52, %v1972_v53  ;;  %v1864_v0 = vld [vmem:[%s3859_s1 + $0xe4] sm:$0xf0]  ;;  %v2568_v1 = vld [vmem:[%s3859_s1 + $0x2a4] sm:$0xf]  ;;  %v1771_v5 = vor.u32 %v2487_v58, %v1768_v59 }
  0x2c   :  { %853 = vmatpush.bf16.msrb.mxu0 %v2151_v12  ;;  %v2092_v2 = vld [vmem:[%s3859_s1 + $0x2ac] sm:$0xf0]  ;;  %v2535_v3 = vld [vmem:[%s3859_s1 + $0x19c] sm:$0xf]  ;;  %v1960_v4 = vld [vmem:[%s3859_s1 + $0x1a4] sm:$0xf0]  ;;  %v1867_v8 = vor.u32 %v2511_v60, %v1864_v0 }
  0x2d   :  { %863 = vmatpush.bf16.msrb.mxu1 %v1819_v13  ;;  %v2484_v7 = vld [vmem:[%s3859_s1 + $0x4] sm:$0xf]  ;;  %v2095_v9 = vor.u32 %v2568_v1, %v2092_v2  ;;  %v1756_v10 = vld [vmem:[%s3859_s1 + $0xc] sm:$0xf0]  ;;  %v1963_v13 = vor.u32 %v2535_v3, %v1960_v4  ;;  %v2565_v14 = vld [vmem:[%s3859_s1 + $0x28c] sm:$0xf] }
  0x2e   :  { %877 = vmatpush.bf16.msrb.mxu2 %v1915_v16  ;;  %v2508_v11 = vld [vmem:[%s3859_s1 + $0xc4] sm:$0xf]  ;;  %v1852_v12 = vld [vmem:[%s3859_s1 + $0xcc] sm:$0xf0]  ;;  %v2080_v15 = vld [vmem:[%s3859_s1 + $0x294] sm:$0xf0] }
  0x2f   :  { %891 = vmatpush.bf16.msrb.mxu3 %v2011_v20  ;;  %v2589_v16 = vld [vmem:[%s3859_s1 + $0x34c] sm:$0xf]  ;;  %v2176_v17 = vld [vmem:[%s3859_s1 + $0x354] sm:$0xf0]  ;;  %v1846_v18 = vld [vmem:[%s3859_s1 + $0xb0] sm:$0xf]  ;;  %v1759_v20 = vor.u32 %v2484_v7, %v1756_v10  ;;  %v1855_v23 = vor.u32 %v2508_v11, %v1852_v12  ;;  %v2083_v24 = vor.u32 %v2565_v14, %v2080_v15 }
  0x30   :  { %854 = vmatpush.bf16.msrb.mxu0 %v2139_v26  ;;  %v2507_v19 = vld [vmem:[%s3859_s1 + $0xb8] sm:$0xf0]  ;;  %v2532_v21 = vld [vmem:[%s3859_s1 + $0x184] sm:$0xf]  ;;  %v1948_v22 = vld [vmem:[%s3859_s1 + $0x18c] sm:$0xf0] }
  0x31   :  { %864 = vmatpush.bf16.msrb.mxu1 %v1807_v27  ;;  %v1942_v25 = vld [vmem:[%s3859_s1 + $0x170] sm:$0xf]  ;;  %v2531_v26 = vld [vmem:[%s3859_s1 + $0x178] sm:$0xf0]  ;;  %v2179_v27 = vor.u32 %v2589_v16, %v2176_v17  ;;  %v1847_v28 = vor.u32 %v2507_v19, %v1846_v18  ;;  %v2586_v31 = vld [vmem:[%s3859_s1 + $0x334] sm:$0xf]  ;;  %v1951_v32 = vor.u32 %v2532_v21, %v1948_v22 }
  0x32   :  { %878 = vmatpush.bf16.msrb.mxu2 %v1903_v29  ;;  %v2562_v29 = vld [vmem:[%s3859_s1 + $0x274] sm:$0xf]  ;;  %v2164_v33 = vld [vmem:[%s3859_s1 + $0x33c] sm:$0xf0]  ;;  %v2504_v35 = vld [vmem:[%s3859_s1 + $0xa0] sm:$0xf0]  ;;  %v1943_v36 = vor.u32 %v2531_v26, %v1942_v25 }
  0x33   :  { %892 = vmatpush.bf16.msrb.mxu3 %v1999_v34  ;;  %2184 = vmatmul.msk.bf16.vlgmr.msrb.gmra.mxu0 %vm787_vm0, %v3110_v47  ;;  %v1834_v34 = vld [vmem:[%s3859_s1 + $0x98] sm:$0xf]  ;;  %v2528_v39 = vld [vmem:[%s3859_s1 + $0x160] sm:$0xf0]  ;;  %v2167_v40 = vor.u32 %v2586_v31, %v2164_v33  ;;  %v2583_v44 = vld [vmem:[%s3859_s1 + $0x31c] sm:$0xf] }
  0x34   :  { %903 = vmatpush.bf16.msra.mxu0 %v2131_v30  ;;  %v2068_v30 = vld [vmem:[%s3859_s1 + $0x27c] sm:$0xf0]  ;;  %v1930_v38 = vld [vmem:[%s3859_s1 + $0x158] sm:$0xf]  ;;  %v2152_v45 = vld [vmem:[%s3859_s1 + $0x324] sm:$0xf0] }
  0x35   :  { %865 = vmatpush.bf16.msrb.mxu1 %v1795_v41  ;;  %v2071_v37 = vor.u32 %v2562_v29, %v2068_v30  ;;  %v1835_v41 = vor.u32 %v2504_v35, %v1834_v34  ;;  %v1822_v46 = vld [vmem:[%s3859_s1 + $0x80] sm:$0xf]  ;;  %v1931_v49 = vor.u32 %v2528_v39, %v1930_v38  ;;  %v2525_v52 = vld [vmem:[%s3859_s1 + $0x148] sm:$0xf0]  ;;  %v2556_v53 = vld [vmem:[%s3859_s1 + $0x244] sm:$0xf] }
  0x36   :  { %879 = vmatpush.bf16.msrb.mxu2 %v1891_v42  ;;  %v2559_v42 = vld [vmem:[%s3859_s1 + $0x25c] sm:$0xf]  ;;  %v1918_v51 = vld [vmem:[%s3859_s1 + $0x140] sm:$0xf]  ;;  %v2580_v58 = vld [vmem:[%s3859_s1 + $0x304] sm:$0xf] }
  0x37   :  { %893 = vmatpush.bf16.msrb.mxu3 %v1987_v48  ;;  %v2501_v48 = vld [vmem:[%s3859_s1 + $0x88] sm:$0xf0]  ;;  %v2140_v59 = vld [vmem:[%s3859_s1 + $0x30c] sm:$0xf0]  ;;  %v1810_v60 = vld [vmem:[%s3859_s1 + $0x68] sm:$0xf]  ;;  %v1919_v1 = vor.u32 %v2525_v52, %v1918_v51 }
  0x38   :  { %904 = vmatpush.bf16.msra.mxu0 %v2119_v43  ;;  %v2056_v43 = vld [vmem:[%s3859_s1 + $0x264] sm:$0xf0]  ;;  %v2038_v0 = vld [vmem:[%s3859_s1 + $0x230] sm:$0xf]  ;;  %v2555_v2 = vld [vmem:[%s3859_s1 + $0x238] sm:$0xf0] }
  0x39   :  { %866 = vmatpush.bf16.msrb.mxu1 %v1783_v55  ;;  %v2059_v50 = vor.u32 %v2559_v42, %v2056_v43  ;;  %v2155_v55 = vor.u32 %v2583_v44, %v2152_v45  ;;  %v2134_v3 = vld [vmem:[%s3859_s1 + $0x2f0] sm:$0xf]  ;;  %v2579_v4 = vld [vmem:[%s3859_s1 + $0x2f8] sm:$0xf0]  ;;  %v1906_v7 = vld [vmem:[%s3859_s1 + $0x128] sm:$0xf]  ;;  %v2039_v11 = vor.u32 %v2555_v2, %v2038_v0 }
  0x3a   :  { %880 = vmatpush.bf16.msrb.mxu2 %v1879_v56  ;;  %v1823_v56 = vor.u32 %v2501_v48, %v1822_v46  ;;  %v2135_v12 = vor.u32 %v2579_v4, %v2134_v3  ;;  %v2495_v14 = vld [vmem:[%s3859_s1 + $0x58] sm:$0xf0]  ;;  %v2026_v15 = vld [vmem:[%s3859_s1 + $0x218] sm:$0xf]  ;;  %v2552_v17 = vld [vmem:[%s3859_s1 + $0x220] sm:$0xf0] }
  0x3b   :  { %894 = vmatpush.bf16.msrb.mxu3 %v1975_v63  ;;  %v2498_v63 = vld [vmem:[%s3859_s1 + $0x70] sm:$0xf0]  ;;  %v2122_v18 = vld [vmem:[%s3859_s1 + $0x2d8] sm:$0xf]  ;;  %v2576_v19 = vld [vmem:[%s3859_s1 + $0x2e0] sm:$0xf0] }
  0x3c   :  { %905 = vmatpush.bf16.msra.mxu0 %v2107_v57  ;;  %v2044_v57 = vld [vmem:[%s3859_s1 + $0x24c] sm:$0xf0]  ;;  %v1811_v10 = vor.u32 %v2498_v63, %v1810_v60  ;;  %v2519_v21 = vld [vmem:[%s3859_s1 + $0x118] sm:$0xf0]  ;;  %v2123_v25 = vor.u32 %v2576_v19, %v2122_v18  ;;  %v2492_v26 = vld [vmem:[%s3859_s1 + $0x40] sm:$0xf0] }
  0x3d   :  { %867 = vmatpush.bf16.msrb.mxu1 %v1771_v5  ;;  %v2047_v5 = vor.u32 %v2556_v53, %v2044_v57 }
  0x3e   :  { %881 = vmatpush.bf16.msrb.mxu2 %v1867_v8  ;;  %v2522_v8 = vld [vmem:[%s3859_s1 + $0x130] sm:$0xf0] }
  0x3f   :  { %895 = vmatpush.bf16.msrb.mxu3 %v1963_v13  ;;  %v1798_v13 = vld [vmem:[%s3859_s1 + $0x50] sm:$0xf]  ;;  %v1907_v16 = vor.u32 %v2522_v8, %v1906_v7 }
  0x40   :  { %906 = vmatpush.bf16.msra.mxu0 %v2095_v9  ;;  %v2143_v9 = vor.u32 %v2580_v58, %v2140_v59  ;;  %v1799_v22 = vor.u32 %v2495_v14, %v1798_v13 }
  0x41   :  { %868 = vmatpush.bf16.msrb.mxu1 %v1759_v20  ;;  %v1894_v20 = vld [vmem:[%s3859_s1 + $0x110] sm:$0xf] }
  0x42   :  { %882 = vmatpush.bf16.msrb.mxu2 %v1855_v23  ;;  %v1786_v23 = vld [vmem:[%s3859_s1 + $0x38] sm:$0xf] }
  0x43   :  { %896 = vmatpush.bf16.msrb.mxu3 %v1951_v32 }
  0x44   :  { %907 = vmatpush.bf16.msra.mxu0 %v2083_v24  ;;  %869 = vmatmul.bf16.vlgmr.msrb.gmra.mxu1 %v2990_v54  ;;  %v2027_v24 = vor.u32 %v2552_v17, %v2026_v15 }
  0x45   :  { %921 = vmatpush.bf16.msra.mxu1 %v2179_v27  ;;  %883 = vmatmul.bf16.vlgmr.msrb.gmra.mxu2 %v3009_v62  ;;  %v2014_v27 = vld [vmem:[%s3859_s1 + $0x200] sm:$0xf] }
  0x46   :  { %931 = vmatpush.bf16.msra.mxu2 %v1847_v28  ;;  %897 = vmatmul.bf16.vlgmr.msrb.gmra.mxu3 %v3007_v61 }
  0x47   :  { %945 = vmatpush.bf16.msra.mxu3 %v1943_v36 }
  0x48   :  { %908 = vmatpush.bf16.msra.mxu0 %v2071_v37 }
  0x49   :  { %922 = vmatpush.bf16.msra.mxu1 %v2167_v40 }
  0x4a   :  { %932 = vmatpush.bf16.msra.mxu2 %v1835_v41 }
  0x4b   :  { %946 = vmatpush.bf16.msra.mxu3 %v1931_v49 }
  0x4c   :  { %909 = vmatpush.bf16.msra.mxu0 %v2059_v50 }
  0x4d   :  { %923 = vmatpush.bf16.msra.mxu1 %v2155_v55 }
  0x4e   :  { %933 = vmatpush.bf16.msra.mxu2 %v1823_v56 }
  0x4f   :  { %947 = vmatpush.bf16.msra.mxu3 %v1919_v1 }
  0x50   :  { %910 = vmatpush.bf16.msra.mxu0 %v2047_v5 }
  0x51   :  { %924 = vmatpush.bf16.msra.mxu1 %v2143_v9 }
  0x52   :  { %934 = vmatpush.bf16.msra.mxu2 %v1811_v10 }
  0x54   :  { %959 = vmatpush.bf16.msrb.mxu0 %v2039_v11 }
  0x55   :  { %973 = vmatpush.bf16.msrb.mxu1 %v2135_v12 }
  0x56   :  { %12 = vsyncpa [#allocation3], 0  ;;  %948 = vmatpush.bf16.msra.mxu3 %v1907_v16  ;;  %911 = vmatmul.bf16.vlgmr.msra.gmra.mxu0 %v3023_v6  ;;  %v1895_v28 = vor.u32 %v2519_v21, %v1894_v20  ;;  %v2549_v29 = vld [vmem:[%s3859_s1 + $0x208] sm:$0xf0]  ;;  %v2110_v30 = vld [vmem:[%s3859_s1 + $0x2c0] sm:$0xf]  ;;  %v1787_v34 = vor.u32 %v2492_v26, %v1786_v23 }
  0x57   :  { %v2573_v31 = vld [vmem:[%s3859_s1 + $0x2c8] sm:$0xf0]  ;;  %v1882_v32 = vld [vmem:[%s3859_s1 + $0xf8] sm:$0xf]  ;;  %v2516_v33 = vld [vmem:[%s3859_s1 + $0x100] sm:$0xf0]  ;;  %935 = vmatpush.bf16.msra.mxu2 %v1799_v22  ;;  %v2015_v35 = vor.u32 %v2549_v29, %v2014_v27  ;;  %2185 = vmatmul.msk.bf16.vlgmr.msra.gmra.mxu1 %vm787_vm0, %v3110_v47 }
  0x58   :  { %960 = vmatpush.bf16.msrb.mxu0 %v2027_v24  ;;  %v2111_v36 = vor.u32 %v2573_v31, %v2110_v30  ;;  %v1774_v37 = vld [vmem:[%s3859_s1 + $0x20] sm:$0xf]  ;;  %v2489_v38 = vld [vmem:[%s3859_s1 + $0x28] sm:$0xf0]  ;;  %v2002_v39 = vld [vmem:[%s3859_s1 + $0x1e8] sm:$0xf]  ;;  %v1883_v40 = vor.u32 %v2516_v33, %v1882_v32 }
  0x59   :  { %974 = vmatpush.bf16.msrb.mxu1 %v2123_v25  ;;  %v2546_v41 = vld [vmem:[%s3859_s1 + $0x1f0] sm:$0xf0]  ;;  %v2098_v42 = vld [vmem:[%s3859_s1 + $0x2a8] sm:$0xf]  ;;  %v1870_v44 = vld [vmem:[%s3859_s1 + $0xe0] sm:$0xf]  ;;  %v1775_v46 = vor.u32 %v2489_v38, %v1774_v37 }
  0x5a   :  { %949 = vmatpush.bf16.msra.mxu3 %v1895_v28  ;;  %v2570_v43 = vld [vmem:[%s3859_s1 + $0x2b0] sm:$0xf0]  ;;  %v2513_v45 = vld [vmem:[%s3859_s1 + $0xe8] sm:$0xf0]  ;;  %v1762_v48 = vld [vmem:[%s3859_s1 + $0x8] sm:$0xf]  ;;  %v2003_v49 = vor.u32 %v2546_v41, %v2002_v39 }
  0x5b   :  { %936 = vmatpush.bf16.msra.mxu2 %v1787_v34  ;;  %v2099_v50 = vor.u32 %v2570_v43, %v2098_v42  ;;  %v2486_v51 = vld [vmem:[%s3859_s1 + $0x10] sm:$0xf0]  ;;  %v1990_v52 = vld [vmem:[%s3859_s1 + $0x1d0] sm:$0xf]  ;;  %v2543_v53 = vld [vmem:[%s3859_s1 + $0x1d8] sm:$0xf0]  ;;  %v1871_v55 = vor.u32 %v2513_v45, %v1870_v44 }
  0x5c   :  { %961 = vmatpush.bf16.msrb.mxu0 %v2015_v35  ;;  %v2086_v56 = vld [vmem:[%s3859_s1 + $0x290] sm:$0xf]  ;;  %v2567_v57 = vld [vmem:[%s3859_s1 + $0x298] sm:$0xf0]  ;;  %v1858_v58 = vld [vmem:[%s3859_s1 + $0xc8] sm:$0xf]  ;;  %v1763_v0 = vor.u32 %v2486_v51, %v1762_v48  ;;  %v1991_v1 = vor.u32 %v2543_v53, %v1990_v52 }
  0x5d   :  { %975 = vmatpush.bf16.msrb.mxu1 %v2111_v36  ;;  %v2510_v59 = vld [vmem:[%s3859_s1 + $0xd0] sm:$0xf0]  ;;  %v2182_v60 = vld [vmem:[%s3859_s1 + $0x350] sm:$0xf]  ;;  %v2591_v63 = vld [vmem:[%s3859_s1 + $0x358] sm:$0xf0]  ;;  %v2087_v2 = vor.u32 %v2567_v57, %v2086_v56 }
  0x5e   :  { %950 = vmatpush.bf16.msra.mxu3 %v1883_v40  ;;  %v1859_v3 = vor.u32 %v2510_v59, %v1858_v58  ;;  %v2183_v4 = vor.u32 %v2591_v63, %v2182_v60  ;;  %v1978_v5 = vld [vmem:[%s3859_s1 + $0x1b8] sm:$0xf]  ;;  %v2540_v7 = vld [vmem:[%s3859_s1 + $0x1c0] sm:$0xf0]  ;;  %v1966_v15 = vld [vmem:[%s3859_s1 + $0x1a0] sm:$0xf] }
  0x5f   :  { %937 = vmatpush.bf16.msra.mxu2 %v1775_v46  ;;  %v2074_v8 = vld [vmem:[%s3859_s1 + $0x278] sm:$0xf]  ;;  %v2564_v9 = vld [vmem:[%s3859_s1 + $0x280] sm:$0xf0]  ;;  %v1979_v12 = vor.u32 %v2540_v7, %v1978_v5  ;;  %v2537_v16 = vld [vmem:[%s3859_s1 + $0x1a8] sm:$0xf0] }
  0x60   :  { %962 = vmatpush.bf16.msrb.mxu0 %v2003_v49  ;;  %v2170_v10 = vld [vmem:[%s3859_s1 + $0x338] sm:$0xf]  ;;  %v2588_v11 = vld [vmem:[%s3859_s1 + $0x340] sm:$0xf0]  ;;  %v2075_v13 = vor.u32 %v2564_v9, %v2074_v8  ;;  %v2062_v17 = vld [vmem:[%s3859_s1 + $0x260] sm:$0xf]  ;;  %v1967_v21 = vor.u32 %v2537_v16, %v1966_v15 }
  0x61   :  { %976 = vmatpush.bf16.msrb.mxu1 %v2099_v50  ;;  %v2171_v14 = vor.u32 %v2588_v11, %v2170_v10  ;;  %v2561_v18 = vld [vmem:[%s3859_s1 + $0x268] sm:$0xf0]  ;;  %v2158_v19 = vld [vmem:[%s3859_s1 + $0x320] sm:$0xf]  ;;  %v1954_v23 = vld [vmem:[%s3859_s1 + $0x188] sm:$0xf] }
  0x62   :  { %951 = vmatpush.bf16.msra.mxu3 %v1871_v55  ;;  %v2585_v20 = vld [vmem:[%s3859_s1 + $0x328] sm:$0xf0]  ;;  %v2063_v22 = vor.u32 %v2561_v18, %v2062_v17  ;;  %v2534_v24 = vld [vmem:[%s3859_s1 + $0x190] sm:$0xf0]  ;;  %v2050_v25 = vld [vmem:[%s3859_s1 + $0x248] sm:$0xf] }
  0x63   :  { %938 = vmatpush.bf16.msra.mxu2 %v1763_v0  ;;  %v2146_v26 = vld [vmem:[%s3859_s1 + $0x308] sm:$0xf]  ;;  %v2582_v27 = vld [vmem:[%s3859_s1 + $0x310] sm:$0xf0]  ;;  %v1955_v28 = vor.u32 %v2534_v24, %v1954_v23  ;;  %v2613_v33 = vld [vmem:[%s3861_s3 + $0xac] sm:$0xf] }
  0x64   :  { %963 = vmatpush.bf16.msrb.mxu0 %v1991_v1  ;;  %v2147_v30 = vor.u32 %v2582_v27, %v2146_v26  ;;  %v2273_v31 = vld [vmem:[%s3861_s3 + $0xa8] sm:$0xf]  ;;  %v2614_v32 = vld [vmem:[%s3861_s3 + $0xb0] sm:$0xf0]  ;;  %v2611_v35 = vld [vmem:[%s3861_s3 + $0x98] sm:$0xf0] }
  0x65   :  { %977 = vmatpush.bf16.msrb.mxu1 %v2087_v2  ;;  %v2274_v34 = vor.u32 %v2614_v32, %v2273_v31  ;;  %v2610_v36 = vld [vmem:[%s3861_s3 + $0x94] sm:$0xf]  ;;  %v2263_v38 = vld [vmem:[%s3861_s3 + $0x9c] sm:$0xf0]  ;;  %v2249_v40 = vld [vmem:[%s3861_s3 + $0x78] sm:$0xf] }
  0x66   :  { %952 = vmatpush.bf16.msra.mxu3 %v1859_v3  ;;  %939 = vmatmul.bf16.vlgmr.msra.gmra.mxu2 %v2990_v54  ;;  %v2159_v54 = vor.u32 %v2585_v20, %v2158_v19  ;;  %v2266_v39 = vor.u32 %v2610_v36, %v2263_v38  ;;  %v2608_v41 = vld [vmem:[%s3861_s3 + $0x80] sm:$0xf0]  ;;  %v2607_v42 = vld [vmem:[%s3861_s3 + $0x7c] sm:$0xf]  ;;  %v2251_v44 = vld [vmem:[%s3861_s3 + $0x84] sm:$0xf0] }
  0x67   :  { %991 = vmatpush.bf16.msrb.mxu2 %v2183_v4  ;;  %v2250_v43 = vor.u32 %v2608_v41, %v2249_v40  ;;  %v2254_v45 = vor.u32 %v2607_v42, %v2251_v44  ;;  %v2237_v46 = vld [vmem:[%s3861_s3 + $0x60] sm:$0xf]  ;;  %v2605_v48 = vld [vmem:[%s3861_s3 + $0x68] sm:$0xf0]  ;;  %v2604_v49 = vld [vmem:[%s3861_s3 + $0x64] sm:$0xf] }
  0x68   :  { %964 = vmatpush.bf16.msrb.mxu0 %v1979_v12  ;;  %v2238_v50 = vor.u32 %v2605_v48, %v2237_v46  ;;  %v2239_v51 = vld [vmem:[%s3861_s3 + $0x6c] sm:$0xf0]  ;;  %v2225_v53 = vld [vmem:[%s3861_s3 + $0x48] sm:$0xf]  ;;  %v2602_v55 = vld [vmem:[%s3861_s3 + $0x50] sm:$0xf0] }
  0x69   :  { %953 = vmatmul.bf16.vlgmr.msra.gmra.mxu3 %v3009_v62  ;;  %978 = vmatpush.bf16.msrb.mxu1 %v2075_v13  ;;  %v2558_v62 = vld [vmem:[%s3859_s1 + $0x250] sm:$0xf0]  ;;  %v2242_v52 = vor.u32 %v2604_v49, %v2239_v51  ;;  %v2369_v56 = vld [vmem:[%s3861_s3 + $0x168] sm:$0xf]  ;;  %v2226_v57 = vor.u32 %v2602_v55, %v2225_v53  ;;  %v2601_v59 = vld [vmem:[%s3861_s3 + $0x4c] sm:$0xf] }
  0x6a   :  { %v2051_v29 = vor.u32 %v2558_v62, %v2050_v25  ;;  %1382 = vmatpush.bf16.msrb.mxu3 %v2274_v34  ;;  %v2638_v58 = vld [vmem:[%s3861_s3 + $0x170] sm:$0xf0]  ;;  %v2227_v60 = vld [vmem:[%s3861_s3 + $0x54] sm:$0xf0]  ;;  %v2213_v1 = vld [vmem:[%s3861_s3 + $0x30] sm:$0xf] }
  0x6b   :  { %992 = vmatpush.bf16.msrb.mxu2 %v2171_v14  ;;  %v2370_v63 = vor.u32 %v2638_v58, %v2369_v56  ;;  %v2230_v0 = vor.u32 %v2601_v59, %v2227_v60  ;;  %v2599_v2 = vld [vmem:[%s3861_s3 + $0x38] sm:$0xf0]  ;;  %v2357_v3 = vld [vmem:[%s3861_s3 + $0x150] sm:$0xf]  ;;  %v2598_v7 = vld [vmem:[%s3861_s3 + $0x34] sm:$0xf] }
  0x6c   :  { %965 = vmatpush.bf16.msrb.mxu0 %v1967_v21  ;;  %v2214_v4 = vor.u32 %v2599_v2, %v2213_v1  ;;  %v2635_v5 = vld [vmem:[%s3861_s3 + $0x158] sm:$0xf0]  ;;  %v2215_v8 = vld [vmem:[%s3861_s3 + $0x3c] sm:$0xf0]  ;;  %v2201_v11 = vld [vmem:[%s3861_s3 + $0x18] sm:$0xf] }
  0x6d   :  { %979 = vmatpush.bf16.msrb.mxu1 %v2063_v22  ;;  %v2358_v9 = vor.u32 %v2635_v5, %v2357_v3  ;;  %v2218_v10 = vor.u32 %v2598_v7, %v2215_v8  ;;  %v2596_v12 = vld [vmem:[%s3861_s3 + $0x20] sm:$0xf0]  ;;  %v2345_v13 = vld [vmem:[%s3861_s3 + $0x138] sm:$0xf]  ;;  %v2595_v16 = vld [vmem:[%s3861_s3 + $0x1c] sm:$0xf] }
  0x6e   :  { %v2202_v14 = vor.u32 %v2596_v12, %v2201_v11  ;;  %v2632_v15 = vld [vmem:[%s3861_s3 + $0x140] sm:$0xf0]  ;;  %v2203_v17 = vld [vmem:[%s3861_s3 + $0x24] sm:$0xf0]  ;;  %v2189_v20 = vld [vmem:[%s3861_s3] sm:$0xf] }
  0x6f   :  { %993 = vmatpush.bf16.msrb.mxu2 %v2159_v54  ;;  %v2346_v18 = vor.u32 %v2632_v15, %v2345_v13  ;;  %v2206_v19 = vor.u32 %v2595_v16, %v2203_v17  ;;  %v2593_v21 = vld [vmem:[%s3861_s3 + $0x8] sm:$0xf0]  ;;  %v2333_v22 = vld [vmem:[%s3861_s3 + $0x120] sm:$0xf]  ;;  %v2592_v24 = vld [vmem:[%s3861_s3 + $0x4] sm:$0xf] }
  0x70   :  { %966 = vmatpush.bf16.msrb.mxu0 %v1955_v28  ;;  %v2190_v54 = vor.u32 %v2593_v21, %v2189_v20  ;;  %v2629_v23 = vld [vmem:[%s3861_s3 + $0x128] sm:$0xf0]  ;;  %v2191_v25 = vld [vmem:[%s3861_s3 + $0xc] sm:$0xf0]  ;;  %v2639_v28 = vld [vmem:[%s3861_s3 + $0x178] sm:$0xf0] }
  0x71   :  { %980 = vmatpush.bf16.msrb.mxu1 %v2051_v29  ;;  %v2334_v62 = vor.u32 %v2629_v23, %v2333_v22  ;;  %v2194_v26 = vor.u32 %v2592_v24, %v2191_v25  ;;  %v2377_v27 = vld [vmem:[%s3861_s3 + $0x170] sm:$0xf]  ;;  %v3576_v29 = vld [vmem:[%s3860_s2] sm:$0x7]  ;;  %v2321_v31 = vld [vmem:[%s3861_s3 + $0x108] sm:$0xf] }
  0x72   :  { %v2626_v32 = vld [vmem:[%s3861_s3 + $0x110] sm:$0xf0]  ;;  %v180_v36 = vperm.slane %v3576_v29, 0  ;;  %v2353_v40 = vld [vmem:[%s3861_s3 + $0x140] sm:$0xf]  ;;  %vm1378_vm1 = vcmask 261120  }
  0x73   :  { %994 = vmatpush.bf16.msrb.mxu2 %v2147_v30  ;;  %967 = vmatmul.bf16.vlgmr.msrb.gmra.mxu0 %v3007_v61  ;;  %v2275_v61 = vld [vmem:[%s3861_s3 + $0xb4] sm:$0xf0]  ;;  %v2378_v30 = vor.u32 %v2639_v28, %v2377_v27  ;;  %v2633_v41 = vld [vmem:[%s3861_s3 + $0x148] sm:$0xf0]  ;;  %v2630_v51 = vld [vmem:[%s3861_s3 + $0x130] sm:$0xf0] }
  0x74   :  { %981 = vmatmul.bf16.vlgmr.msrb.gmra.mxu1 %v3023_v6  ;;  %v2278_v6 = vor.u32 %v2613_v33, %v2275_v61  ;;  %1396 = vmatpush.bf16.msra.mxu0 %v2370_v63  ;;  %v2365_v33 = vld [vmem:[%s3861_s3 + $0x158] sm:$0xf]  ;;  %v2322_v61 = vor.u32 %v2626_v32, %v2321_v31  ;;  %v2285_v58 = vld [vmem:[%s3861_s3 + $0xc0] sm:$0xf]  ;;  %v2617_v59 = vld [vmem:[%s3861_s3 + $0xc8] sm:$0xf0] }
  0x75   :  { %v2297_v44 = vld [vmem:[%s3861_s3 + $0xd8] sm:$0xf]  ;;  %v2286_v60 = vor.u32 %v2617_v59, %v2285_v58  ;;  %v2281_v63 = vld [vmem:[%s3861_s3 + $0xb0] sm:$0xf]  ;;  %v2627_v5 = vld [vmem:[%s3861_s3 + $0x118] sm:$0xf0] }
  0x76   :  { %2186 = vmatmul.msk.bf16.vlgmr.msrb.gmra.mxu2 %vm787_vm0, %v3110_v47  ;;  %v2261_v47 = vld [vmem:[%s3861_s3 + $0x90] sm:$0xf]  ;;  %v2612_v11 = vld [vmem:[%s3861_s3 + $0xa0] sm:$0xf0]  ;;  %v2317_v12 = vld [vmem:[%s3861_s3 + $0xf8] sm:$0xf] }
  0x77   :  { %v2262_v37 = vor.u32 %v2611_v35, %v2261_v47  ;;  %1424 = vmatpush.bf16.msra.mxu2 %v2278_v6  ;;  %v2636_v6 = vld [vmem:[%s3861_s3 + $0x160] sm:$0xf0]  ;;  %v2309_v47 = vld [vmem:[%s3861_s3 + $0xf0] sm:$0xf]  ;;  %v2623_v35 = vld [vmem:[%s3861_s3 + $0xf8] sm:$0xf0] }
  0x78   :  { %1397 = vmatpush.bf16.msra.mxu0 %v2358_v9  ;;  %v2366_v38 = vor.u32 %v2636_v6, %v2365_v33  ;;  %v2329_v1 = vld [vmem:[%s3861_s3 + $0x110] sm:$0xf]  ;;  %v2624_v16 = vld [vmem:[%s3861_s3 + $0x100] sm:$0xf0]  ;;  %v2609_v20 = vld [vmem:[%s3861_s3 + $0x88] sm:$0xf0] }
  0x79   :  { %1383 = vmatpush.bf16.msrb.mxu3 %v2262_v37  ;;  %v2330_v7 = vor.u32 %v2627_v5, %v2329_v1  ;;  %v2305_v21 = vld [vmem:[%s3861_s3 + $0xe0] sm:$0xf]  ;;  %v2621_v24 = vld [vmem:[%s3861_s3 + $0xe8] sm:$0xf0]  ;;  %v2606_v27 = vld [vmem:[%s3861_s3 + $0x70] sm:$0xf0] }
  0x7a   :  { %v2306_v25 = vor.u32 %v2621_v24, %v2305_v21  ;;  %v2293_v28 = vld [vmem:[%s3861_s3 + $0xc8] sm:$0xf]  ;;  %v2618_v33 = vld [vmem:[%s3861_s3 + $0xd0] sm:$0xf0]  ;;  %v2233_v6 = vld [vmem:[%s3861_s3 + $0x50] sm:$0xf] }
  0x7b   :  { %1425 = vmatpush.bf16.msra.mxu2 %v2266_v39  ;;  %v2310_v39 = vor.u32 %v2623_v35, %v2309_v47  ;;  %v2603_v47 = vld [vmem:[%s3861_s3 + $0x58] sm:$0xf0]  ;;  %v2644_v58 = vld [vmem:[%s3861_s3 + $0x1a0] sm:$0xf0]  ;;  %v2347_v24 = vld [vmem:[%s3861_s3 + $0x144] sm:$0xf0] }
  0x7c   :  { %1398 = vmatpush.bf16.msra.mxu0 %v2346_v18  ;;  %v2318_v18 = vor.u32 %v2624_v16, %v2317_v12  ;;  %v2359_v16 = vld [vmem:[%s3861_s3 + $0x15c] sm:$0xf0]  ;;  %s2698_s27 = smov [#allocation2]   ;;  %s1720_s29 = sshll.u32 %s3865_s7, 4  ;;  %s1721_s29 = int_to_ptr.hbm [resolvable:$true] %s1720_s29 }
  0x7d   :  { %1384 = vmatpush.bf16.msrb.mxu3 %v2250_v43  ;;  %v2354_v43 = vor.u32 %v2633_v41, %v2353_v40  ;;  %v2600_v40 = vld [vmem:[%s3861_s3 + $0x40] sm:$0xf0]  ;;  %s1718_s0 = sshll.u32 %s2698_s27, 4  ;;  %s2699_s30 = smov 128   ;;  %s1719_s0 = int_to_ptr.vmem [resolvable:$true] %s1718_s0 }
  0x7e   :  { %s2700_s1 = smov 8  }
  0x7f   :  { %1426 = vmatpush.bf16.msra.mxu2 %v2254_v45  ;;  %v2620_v45 = vld [vmem:[%s3861_s3 + $0xe0] sm:$0xf0] }
  0x80   :  { %1399 = vmatpush.bf16.msra.mxu0 %v2334_v62  ;;  %v2298_v48 = vor.u32 %v2620_v45, %v2297_v44  ;;  %v2209_v44 = vld [vmem:[%s3861_s3 + $0x20] sm:$0xf]  ;;  %v2597_v45 = vld [vmem:[%s3861_s3 + $0x28] sm:$0xf0] }
  0x81   :  { %1385 = vmatpush.bf16.msrb.mxu3 %v2238_v50  ;;  %v2341_v50 = vld [vmem:[%s3861_s3 + $0x128] sm:$0xf] }
  0x82   :  { %v2342_v56 = vor.u32 %v2630_v51, %v2341_v50  ;;  %v2197_v51 = vld [vmem:[%s3861_s3 + $0x8] sm:$0xf] }
  0x83   :  { %1427 = vmatpush.bf16.msra.mxu2 %v2242_v52 }
  0x84   :  { %1400 = vmatpush.bf16.msra.mxu0 %v2322_v61 }
  0x85   :  { %1386 = vmatpush.bf16.msrb.mxu3 %v2226_v57 }
  0x87   :  { %1428 = vmatpush.bf16.msra.mxu2 %v2230_v0  ;;  %v2615_v0 = vld [vmem:[%s3861_s3 + $0xb8] sm:$0xf0] }
  0x88   :  { %1401 = vmatpush.bf16.msra.mxu0 %v2310_v39  ;;  %v2221_v39 = vld [vmem:[%s3861_s3 + $0x38] sm:$0xf] }
  0x89   :  { %1387 = vmatpush.bf16.msrb.mxu3 %v2214_v4  ;;  %v2282_v4 = vor.u32 %v2615_v0, %v2281_v63  ;;  %v2222_v41 = vor.u32 %v2600_v40, %v2221_v39  ;;  %v2311_v40 = vld [vmem:[%s3861_s3 + $0xfc] sm:$0xf0] }
  0x8b   :  { %1429 = vmatpush.bf16.msra.mxu2 %v2218_v10  ;;  %v2269_v10 = vld [vmem:[%s3861_s3 + $0x98] sm:$0xf] }
  0x8c   :  { %1402 = vmatpush.bf16.msra.mxu0 %v2298_v48  ;;  %v2270_v15 = vor.u32 %v2612_v11, %v2269_v10  ;;  %v2210_v48 = vor.u32 %v2597_v45, %v2209_v44  ;;  %v2619_v45 = vld [vmem:[%s3861_s3 + $0xdc] sm:$0xf] }
  0x8d   :  { %1388 = vmatpush.bf16.msrb.mxu3 %v2202_v14 }
  0x8f   :  { %1430 = vmatpush.bf16.msra.mxu2 %v2206_v19  ;;  %v2257_v19 = vld [vmem:[%s3861_s3 + $0x80] sm:$0xf] }
  0x90   :  { %1403 = vmatpush.bf16.msra.mxu0 %v2286_v60  ;;  %v2258_v23 = vor.u32 %v2609_v20, %v2257_v19 }
  0x91   :  { %1389 = vmatpush.bf16.msrb.mxu3 %v2190_v54 }
  0x93   :  { %1431 = vmatpush.bf16.msra.mxu2 %v2194_v26  ;;  %v2245_v26 = vld [vmem:[%s3861_s3 + $0x68] sm:$0xf] }
  0x94   :  { %1466 = vmatpush.bf16.msrb.mxu0 %v2282_v4  ;;  %v2246_v32 = vor.u32 %v2606_v27, %v2245_v26  ;;  %v2640_v27 = vld [vmem:[%s3861_s3 + $0x184] sm:$0xf] }
  0x97   :  { %1480 = vmatpush.bf16.msrb.mxu2 %v2378_v30 }
  0x98   :  { %1467 = vmatpush.bf16.msrb.mxu0 %v2270_v15  ;;  %v2634_v15 = vld [vmem:[%s3861_s3 + $0x154] sm:$0xf] }
  0x99   :  { %v2362_v19 = vor.u32 %v2634_v15, %v2359_v16  ;;  %v2651_v15 = vld [vmem:[%s3863_s5 + $0x28] sm:$0xff]  ;;  %v2650_v16 = vld [vmem:[%s3863_s5 + $0x20] sm:$0xff] }
  0x9b   :  { %1481 = vmatpush.bf16.msrb.mxu2 %v2366_v38  ;;  %v181_v38 = vperm.slane %v3576_v29, 1 }
  0x9c   :  { %1468 = vmatpush.bf16.msrb.mxu0 %v2258_v23  ;;  %v2631_v23 = vld [vmem:[%s3861_s3 + $0x13c] sm:$0xf] }
  0x9f   :  { %1482 = vmatpush.bf16.msrb.mxu2 %v2354_v43 }
  0xa0   :  { %v800_v34 = vpop.f32.mrf.mxu0  ;;  %1469 = vmatpush.bf16.msrb.mxu0 %v2246_v32  ;;  %v2335_v32 = vld [vmem:[%s3861_s3 + $0x12c] sm:$0xf0] }
  0xa1   :  { %v814_v37 = vpop.f32.mrf.mxu1  ;;  %v801_v42 = vadd.f32 %v800_v34, %v180_v36  ;;  %v2294_v34 = vor.u32 %v2618_v33, %v2293_v28  ;;  %v2383_v28 = vld [vmem:[%s3861_s3 + $0x18c] sm:$0xf0] }
  0xa3   :  { %v815_v53 = vadd.f32 %v814_v37, %v801_v42  ;;  %1483 = vmatpush.bf16.msrb.mxu2 %v2342_v56  ;;  %v2234_v37 = vor.u32 %v2603_v47, %v2233_v6  ;;  %v2401_v47 = vld [vmem:[%s3861_s3 + $0x1a0] sm:$0xf] }
  0xa5   :  { %1470 = vmatpush.bf16.msrb.mxu0 %v2234_v37  ;;  %v2622_v37 = vld [vmem:[%s3861_s3 + $0xf4] sm:$0xf] }
  0xa7   :  { %1484 = vmatpush.bf16.msrb.mxu2 %v2330_v7 }
  0xa8   :  { %v828_v46 = vpop.f32.mrf.mxu2  ;;  %v802_v49 = vpop.f32.mrf.mxu0 }
  0xa9   :  { %v803_v52 = vadd.f32 %v802_v49, %v180_v36  ;;  %v842_v55 = vpop.f32.mrf.mxu3  ;;  %v816_v57 = vpop.f32.mrf.mxu1  ;;  %v829_v2 = vadd.f32 %v828_v46, %v815_v53  ;;  %1471 = vmatpush.bf16.msrb.mxu0 %v2222_v41  ;;  %v2389_v41 = vld [vmem:[%s3861_s3 + $0x188] sm:$0xf] }
  0xab   :  { %v817_v3 = vadd.f32 %v816_v57, %v803_v52  ;;  %v843_v13 = vadd.f32 %v842_v55, %v829_v2  ;;  %1485 = vmatpush.bf16.msrb.mxu2 %v2318_v18  ;;  %v2594_v52 = vld [vmem:[%s3861_s3 + $0x10] sm:$0xf0]  ;;  %v2393_v57 = vld [vmem:[%s3861_s3 + $0x198] sm:$0xf]  ;;  %v2381_v2 = vld [vmem:[%s3861_s3 + $0x180] sm:$0xf] }
  0xac   :  { %v2198_v55 = vor.u32 %v2594_v52, %v2197_v51  ;;  %v2394_v60 = vor.u32 %v2644_v58, %v2393_v57  ;;  %v2395_v18 = vld [vmem:[%s3861_s3 + $0x1a4] sm:$0xf0]  ;;  %v2616_v52 = vld [vmem:[%s3861_s3 + $0xc4] sm:$0xf] }
  0xad   :  { %1472 = vmatpush.bf16.msrb.mxu0 %v2210_v48 }
  0xae   :  { %1416 = vmatpush.bf16.msra.mxu1 %v2394_v60 }
  0xaf   :  { %1486 = vmatpush.bf16.msrb.mxu2 %v2306_v25  ;;  %v2350_v25 = vor.u32 %v2631_v23, %v2347_v24  ;;  %v2658_v23 = vld [vmem:[%s3863_s5 + $0x60] sm:$0xff]  ;;  %v2657_v24 = vld [vmem:[%s3863_s5 + $0x58] sm:$0xff] }
  0xb0   :  { %v830_v8 = vpop.f32.mrf.mxu2  ;;  %v856_v9 = vpop.f32.mrf.mxu0 }
  0xb1   :  { %v831_v14 = vadd.f32 %v830_v8, %v817_v3  ;;  %v844_v17 = vpop.f32.mrf.mxu3  ;;  %v857_v22 = vadd.f32 %v856_v9, %v843_v13  ;;  %1473 = vmatpush.bf16.msrb.mxu0 %v2198_v55  ;;  %v2641_v3 = vld [vmem:[%s3861_s3 + $0x188] sm:$0xf0]  ;;  %v2371_v9 = vld [vmem:[%s3861_s3 + $0x174] sm:$0xf0] }
  0xb2   :  { %v2382_v7 = vor.u32 %v2641_v3, %v2381_v2  ;;  %v2637_v8 = vld [vmem:[%s3861_s3 + $0x16c] sm:$0xf] }
  0xb3   :  { %v845_v54 = vadd.f32 %v844_v17, %v831_v14  ;;  %v1001_v30 = vmax.f32 %v857_v22, 0.0  ;;  %1487 = vmatpush.bf16.msrb.mxu2 %v2294_v34  ;;  %v2374_v11 = vor.u32 %v2637_v8, %v2371_v9  ;;  %v2643_v17 = vld [vmem:[%s3861_s3 + $0x19c] sm:$0xf]  ;;  %v2625_v34 = vld [vmem:[%s3861_s3 + $0x10c] sm:$0xf] }
  0xb4   :  { %1417 = vmatpush.bf16.msra.mxu1 %v2382_v7  ;;  %v2398_v20 = vor.u32 %v2643_v17, %v2395_v18  ;;  %v2649_v17 = vld [vmem:[%s3863_s5 + $0x18] sm:$0xff] }
  0xb5   :  { %v2661_v18 = vld [vmem:[%s3863_s5 + $0x78] sm:$0xff] }
  0xb6   :  { %1458 = vmatpush.bf16.msra.mxu3 %v2398_v20  ;;  %v2660_v20 = vld [vmem:[%s3863_s5 + $0x70] sm:$0xff] }
  0xb8   :  { %v858_v62 = vpop.f32.mrf.mxu0  ;;  %1438 = vmatpush.bf16.msrb.mxu1 %v2374_v11 }
  0xb9   :  { %v859_v31 = vadd.f32 %v858_v62, %v845_v54 }
  0xbb   :  { %v1004_v61 = vmax.f32 %v859_v31, 0.0  ;;  %v2386_v31 = vor.u32 %v2640_v27, %v2383_v28  ;;  %v2655_v27 = vld [vmem:[%s3863_s5 + $0x48] sm:$0xff]  ;;  %v1082_v28 = vld [vmem:[%s3862_s4] sm:$0x7] }
  0xbc   :  { %1439 = vmatpush.bf16.msrb.mxu1 %v2362_v19  ;;  %v2648_v19 = vld [vmem:[%s3863_s5 + $0x10] sm:$0xff] }
  0xbd   :  { %v3675_v35 = vpack.c.bf16 %v1004_v61, %v1001_v30  ;;  %v2628_v30 = vld [vmem:[%s3861_s3 + $0x124] sm:$0xf]  ;;  %1459 = vmatpush.bf16.msra.mxu3 %v2386_v31  ;;  %v2323_v61 = vld [vmem:[%s3861_s3 + $0x114] sm:$0xf0] }
  0xbe   :  { %v2338_v33 = vor.u32 %v2628_v30, %v2335_v32  ;;  %v2326_v6 = vor.u32 %v2625_v34, %v2323_v61  ;;  %v2663_v30 = vld [vmem:[%s3863_s5 + $0x88] sm:$0xff]  ;;  %v2654_v31 = vld [vmem:[%s3863_s5 + $0x40] sm:$0xff] }
  0xbf   :  { %1390 = vmatmul.bf16.vlgmr.msrb.gmra.mxu3 %v3675_v35  ;;  %1432 = vmatmul.bf16.vlgmr.msra.gmra.mxu2 %v3675_v35 }
  0xc0   :  { %1440 = vmatpush.bf16.msrb.mxu1 %v2350_v25 }
  0xc1   :  { %v870_v36 = vpop.f32.mrf.mxu1 }
  0xc2   :  { %v871_v42 = vadd.f32 %v870_v36, %v181_v38  ;;  %v2645_v36 = vld [vmem:[%s3861_s3 + $0x1a8] sm:$0xf0] }
  0xc3   :  { %v2402_v39 = vor.u32 %v2645_v36, %v2401_v47 }
  0xc4   :  { %1441 = vmatpush.bf16.msrb.mxu1 %v2338_v33  ;;  %v1084_v33 = vperm.slane %v1082_v28, 0 }
  0xc5   :  { %1500 = vmatpush.bf16.msrb.mxu3 %v2402_v39 }
  0xc8   :  { %v884_v43 = vpop.f32.mrf.mxu2  ;;  %1442 = vmatpush.bf16.msrb.mxu1 %v2326_v6  ;;  %v2662_v6 = vld [vmem:[%s3863_s5 + $0x80] sm:$0xff] }
  0xc9   :  { %v872_v46 = vpop.f32.mrf.mxu1  ;;  %v885_v49 = vadd.f32 %v884_v43, %v871_v42  ;;  %v898_v50 = vpop.f32.mrf.mxu3  ;;  %v2642_v42 = vld [vmem:[%s3861_s3 + $0x190] sm:$0xf0]  ;;  %v2314_v43 = vor.u32 %v2622_v37, %v2311_v40 }
  0xca   :  { %v873_v53 = vadd.f32 %v872_v46, %v181_v38  ;;  %v2390_v44 = vor.u32 %v2642_v42, %v2389_v41  ;;  %v2299_v46 = vld [vmem:[%s3861_s3 + $0xe4] sm:$0xf0] }
  0xcb   :  { %v899_v59 = vadd.f32 %v898_v50, %v885_v49  ;;  %v2302_v49 = vor.u32 %v2619_v45, %v2299_v46  ;;  %v182_v50 = vperm.slane %v3576_v29, 2 }
  0xcc   :  { %1443 = vmatpush.bf16.msrb.mxu1 %v2314_v43  ;;  %1501 = vmatpush.bf16.msrb.mxu3 %v2390_v44 }
  0xd0   :  { %v886_v63 = vpop.f32.mrf.mxu2  ;;  %1444 = vmatpush.bf16.msrb.mxu1 %v2302_v49 }
  0xd1   :  { %v887_v0 = vadd.f32 %v886_v63, %v873_v53  ;;  %v900_v5 = vpop.f32.mrf.mxu3  ;;  %v2287_v53 = vld [vmem:[%s3861_s3 + $0xcc] sm:$0xf0] }
  0xd3   :  { %v912_v56 = vpop.f32.mrf.mxu0  ;;  %v901_v10 = vadd.f32 %v900_v5, %v887_v0 }
  0xd4   :  { %v926_v1 = vpop.f32.mrf.mxu1  ;;  %v913_v4 = vadd.f32 %v912_v56, %v899_v59  ;;  %v2290_v56 = vor.u32 %v2616_v52, %v2287_v53 }
  0xd6   :  { %v927_v13 = vadd.f32 %v926_v1, %v913_v4  ;;  %1445 = vmatpush.bf16.msrb.mxu1 %v2290_v56  ;;  %v1086_v56 = vperm.slane %v1082_v28, 2 }
  0xd8   :  { %v1002_v22 = vmax.f32 %v927_v13, 0.0 }
  0xdb   :  { %v914_v12 = vpop.f32.mrf.mxu0 }
  0xdc   :  { %v915_v14 = vadd.f32 %v914_v12, %v901_v10  ;;  %v928_v21 = vpop.f32.mrf.mxu1 }
  0xde   :  { %v929_v54 = vadd.f32 %v928_v21, %v915_v14  ;;  %v2652_v14 = vld [vmem:[%s3863_s5 + $0x30] sm:$0xff]  ;;  %v2647_v21 = vld [vmem:[%s3863_s5 + $0x8] sm:$0xff] }
  0xe0   :  { %v1005_v62 = vmax.f32 %v929_v54, 0.0  ;;  %v2646_v54 = vld [vmem:[%s3863_s5] sm:$0xff] }
  0xe2   :  { %v3734_v26 = vpack.c.bf16 %v1005_v62, %v1002_v22  ;;  %v2659_v22 = vld [vmem:[%s3863_s5 + $0x68] sm:$0xff]  ;;  %v2656_v62 = vld [vmem:[%s3863_s5 + $0x50] sm:$0xff] }
  0xe4   :  { %1404 = vmatmul.bf16.vlgmr.msra.gmra.mxu0 %v3734_v26  ;;  %1488 = vmatmul.bf16.vlgmr.msrb.gmra.mxu2 %v3734_v26 }
  0xe5   :  { %1702 = vmatpush.bf16.msra.mxu0 %v2663_v30 }
  0xe9   :  { %v940_v38 = vpop.f32.mrf.mxu2  ;;  %1703 = vmatpush.bf16.msra.mxu0 %v2662_v6 }
  0xea   :  { %v941_v57 = vadd.f32 %v940_v38, %v182_v50 }
  0xec   :  { %v954_v48 = vpop.f32.mrf.mxu3 }
  0xed   :  { %v955_v29 = vadd.f32 %v954_v48, %v941_v57 }
  0xf0   :  { %v968_v51 = vpop.f32.mrf.mxu0 }
  0xf1   :  { %v942_v55 = vpop.f32.mrf.mxu2  ;;  %v982_v58 = vpop.f32.mrf.mxu1  ;;  %v969_v1 = vadd.f32 %v968_v51, %v955_v29  ;;  %v1085_v51 = vperm.slane %v1082_v28, 1 }
  0xf2   :  { %v943_v59 = vadd.f32 %v942_v55, %v182_v50 }
  0xf3   :  { %v983_v4 = vadd.f32 %v982_v58, %v969_v1 }
  0xf4   :  { %1474 = vmatmul.bf16.vlgmr.msrb.gmra.mxu0 %v3675_v35  ;;  %v956_v60 = vpop.f32.mrf.mxu3  ;;  %v2653_v35 = vld [vmem:[%s3863_s5 + $0x38] sm:$0xff] }
  0xf5   :  { %v957_v2 = vadd.f32 %v956_v60, %v943_v59 }
  0xf8   :  { %v970_v63 = vpop.f32.mrf.mxu0 }
  0xf9   :  { %v996_v0 = vpop.f32.mrf.mxu2  ;;  %v971_v3 = vadd.f32 %v970_v63, %v957_v2  ;;  %v984_v5 = vpop.f32.mrf.mxu1 }
  0xfa   :  { %v997_v8 = vadd.f32 %v996_v0, %v983_v4 }
  0xfb   :  { %v985_v7 = vadd.f32 %v984_v5, %v971_v3 }
  0xfc   :  { %v1003_v11 = vmax.f32 %v997_v8, 0.0 }
 0x101   :  { %v998_v9 = vpop.f32.mrf.mxu2 }
 0x102   :  { %v999_v10 = vadd.f32 %v998_v9, %v985_v7 }
 0x104   :  { %v1006_v12 = vmax.f32 %v999_v10, 0.0 }
 0x106   :  { %v1009_v13 = vpack.c.bf16 %v1006_v12, %v1003_v11 }
 0x108   :  { %2403 = vmatmul.msk.bf16.vlgmr.msra.gmra.mxu1 %vm1378_vm1, %v1009_v13  ;;  %2404 = vmatmul.msk.bf16.vlgmr.msra.gmra.mxu3 %vm1378_vm1, %v1009_v13 }
 0x109   :  { %1668 = vmatpush.bf16.msra.mxu1 %v2653_v35  ;;  %1682 = vmatpush.bf16.msra.mxu3 %v2661_v18 }
 0x10d   :  { %1669 = vmatpush.bf16.msra.mxu1 %v2652_v14  ;;  %1683 = vmatpush.bf16.msra.mxu3 %v2660_v20 }
 0x111   :  { %1670 = vmatpush.bf16.msra.mxu1 %v2651_v15  ;;  %1684 = vmatpush.bf16.msra.mxu3 %v2659_v22 }
 0x115   :  { %1671 = vmatpush.bf16.msra.mxu1 %v2650_v16  ;;  %1685 = vmatpush.bf16.msra.mxu3 %v2658_v23 }
 0x118   :  { %1446 = vmatmul.bf16.vlgmr.msrb.gmra.mxu1 %v3734_v26  ;;  %2405 = vmatmul.msk.bf16.vlgmr.msrb.gmra.mxu3 %vm1378_vm1, %v1009_v13 }
 0x119   :  { %1672 = vmatpush.bf16.msra.mxu1 %v2649_v17  ;;  %1686 = vmatpush.bf16.msra.mxu3 %v2657_v24  ;;  %v2667_v17 = vld [vmem:[%s3864_s6] ss:$0 sm:$0xff] }
 0x11d   :  { %1673 = vmatpush.bf16.msra.mxu1 %v2648_v19  ;;  %1687 = vmatpush.bf16.msra.mxu3 %v2656_v62 }
 0x121   :  { %1674 = vmatpush.bf16.msra.mxu1 %v2647_v21  ;;  %1688 = vmatpush.bf16.msra.mxu3 %v2655_v27 }
 0x125   :  { %1675 = vmatpush.bf16.msra.mxu1 %v2646_v54  ;;  %1689 = vmatpush.bf16.msra.mxu3 %v2654_v31 }
 0x142   :  { %v1391_v25 = vpop.f32.mrf.mxu3  ;;  %v1433_v34 = vpop.f32.mrf.mxu2 }
 0x143   :  { %v1392_v36 = vadd.f32 %v1391_v25, %v1084_v33  ;;  %v1434_v55 = vadd.f32 %v1433_v34, %v1085_v51 }
 0x14a   :  { %v1393_v32 = vpop.f32.mrf.mxu3  ;;  %v1435_v44 = vpop.f32.mrf.mxu2 }
 0x14b   :  { %v1394_v37 = vadd.f32 %v1393_v32, %v1084_v33  ;;  %v1436_v60 = vadd.f32 %v1435_v44, %v1085_v51 }
 0x161   :  { %v1405_v26 = vpop.f32.mrf.mxu0 }
 0x162   :  { %v1406_v38 = vadd.f32 %v1405_v26, %v1392_v36 }
 0x167   :  { %v1489_v53 = vpop.f32.mrf.mxu2 }
 0x169   :  { %v1407_v47 = vpop.f32.mrf.mxu0 }
 0x16a   :  { %v1408_v40 = vadd.f32 %v1407_v47, %v1394_v37 }
 0x16f   :  { %v1491_v5 = vpop.f32.mrf.mxu2 }
 0x171   :  { %v1475_v48 = vpop.f32.mrf.mxu0 }
 0x172   :  { %v1476_v29 = vadd.f32 %v1475_v48, %v1086_v56 }
 0x174   :  { %v1490_v3 = vadd.f32 %v1489_v53, %v1476_v29 }
 0x179   :  { %v1477_v58 = vpop.f32.mrf.mxu0 }
 0x17a   :  { %v1478_v0 = vadd.f32 %v1477_v58, %v1086_v56 }
 0x17c   :  { %v1492_v10 = vadd.f32 %v1491_v5, %v1478_v0 }
 0x185   :  { %v1419_v61 = vpop.f32.mrf.mxu1 }
 0x186   :  { %v1420_v41 = vadd.f32 %v1419_v61, %v1406_v38 }
 0x188   :  { %v1508_v45 = vmax.f32 %v1420_v41, 0.0 }
 0x18b   :  { %v1461_v39 = vpop.f32.mrf.mxu3 }
 0x18d   :  { %v1421_v42 = vpop.f32.mrf.mxu1 }
 0x18e   :  { %v1422_v43 = vadd.f32 %v1421_v42, %v1408_v40 }
 0x190   :  { %v1511_v46 = vmax.f32 %v1422_v43, 0.0 }
 0x192   :  { %v1514_v49 = vpack.c.bf16 %v1511_v46, %v1508_v45 }
 0x193   :  { %v1463_v50 = vpop.f32.mrf.mxu3 }
 0x194   :  { %1676 = vmatmul.bf16.vlgmr.msra.gmra.mxu1 %v1514_v49 }
 0x195   :  { %v1447_v52 = vpop.f32.mrf.mxu1 }
 0x196   :  { %v1448_v57 = vadd.f32 %v1447_v52, %v1434_v55 }
 0x198   :  { %v1462_v1 = vadd.f32 %v1461_v39, %v1448_v57 }
 0x19a   :  { %v1509_v7 = vmax.f32 %v1462_v1, 0.0 }
 0x19b   :  { %v1503_v59 = vpop.f32.mrf.mxu3 }
 0x19c   :  { %v1504_v8 = vadd.f32 %v1503_v59, %v1490_v3 }
 0x19d   :  { %v1449_v63 = vpop.f32.mrf.mxu1 }
 0x19e   :  { %v1450_v2 = vadd.f32 %v1449_v63, %v1436_v60  ;;  %v1510_v35 = vmax.f32 %v1504_v8, 0.0 }
 0x1a0   :  { %v1464_v4 = vadd.f32 %v1463_v50, %v1450_v2 }
 0x1a2   :  { %v1512_v9 = vmax.f32 %v1464_v4, 0.0 }
 0x1a3   :  { %v1505_v11 = vpop.f32.mrf.mxu3 }
 0x1a4   :  { %v1515_v12 = vpack.c.bf16 %v1512_v9, %v1509_v7  ;;  %v1506_v13 = vadd.f32 %v1505_v11, %v1492_v10 }
 0x1a6   :  { %v1513_v14 = vmax.f32 %v1506_v13, 0.0  ;;  %1690 = vmatmul.bf16.vlgmr.msra.gmra.mxu3 %v1515_v12 }
 0x1a8   :  { %v1516_v15 = vpack.c.bf16 %v1513_v14, %v1510_v35 }
 0x1aa   :  { %2478 = vmatmul.msk.bf16.vlgmr.msra.gmra.mxu0 %vm1378_vm1, %v1516_v15 }
 0x211   :  { %v1677_v16 = vpop.f32.mrf.mxu1 }
 0x212   :  { %v1678_v18 = vadd.f32 %v2667_v17, %v1677_v16 }
 0x219   :  { %v1679_v54 = vpop.f32.mrf.mxu1 }
 0x21a   :  { %v1680_v23 = vadd.f32 %v2667_v17, %v1679_v54 }
 0x227   :  { %v1705_v19 = vpop.f32.mrf.mxu0 }
 0x229   :  { %v1691_v20 = vpop.f32.mrf.mxu3 }
 0x22a   :  { %v1692_v21 = vadd.f32 %v1691_v20, %v1678_v18 }
 0x22c   :  { %v1706_v22 = vadd.f32 %v1705_v19, %v1692_v21 }
 0x22e   :  { %2668 = vtanh.f32 %v1706_v22 }
 0x22f   :  { %v1707_v62 = vpop.f32.mrf.mxu0 }
 0x231   :  { %v1693_v24 = vpop.f32.mrf.mxu3 }
 0x232   :  { %v1694_v25 = vadd.f32 %v1693_v24, %v1680_v23 }
 0x234   :  { %v2669_v26 = vpop.eup %2668  ;;  %v1708_v27 = vadd.f32 %v1707_v62, %v1694_v25 }
 0x235   :  { %1712 = vst.msk [vmem:[#allocation2] sm:$0xff] %vm1378_vm1, %v2669_v26 }
 0x236   :  { %2670 = vtanh.f32 %v1708_v27 }
 0x23c   :  { %v2671_v28 = vpop.eup %2670 }
 0x23d   :  { %1713 = vst.msk [vmem:[#allocation2 + $0x8] sm:$0xff] %vm1378_vm1, %v2671_v28 }
 0x23e   :  { %1726 = dma.vmem_to_hbm [thread:$0]  %s1719_s0, 256, %s1721_s29, [#allocation3], %s2699_s30, %s2699_s30, %s2700_s1  }
 0x23f   :  { %2696 = dma.done.wait [#allocation3], 256  }
 0x240   :  { %2697 = vsyncadd [#allocation3], 4294967040 }
 0x241   :  { %1731 = vsyncpa [#allocation3], 1 }

</bundles_post_ra>
